<compile_context>
chip_gen: v7x
topology: tpu7x:2x2x1
jax: 0.10.0
libtpu: 0.0.40
codegen_flags: <defaults>
</compile_context>

<pallas_src>
import jax
import jax.numpy as jnp
from jax.experimental import pallas as pl
from jax.experimental.pallas import tpu as pltpu


def convnet_kernel(x_ref, w1_ref, b1_ref, w2_ref, b2_ref,
                   wht_ref, bh_ref, wnt_ref, wnb_ref, drop_ref, out_ref):
    # x_ref   : (C, B, L)   input, batch folded next to the length (lane) axis
    # w1_ref  : (M, K*C)    conv1 weights, im2col-flattened (k-major, c-minor)
    # b1_ref  : (M, 1)      conv1 bias
    # w2_ref  : (M, K*M)    conv2 weights, im2col-flattened (k-major, m-minor)
    # b2_ref  : (M, 1)      conv2 bias
    # wht_ref : (32, 2M)    hidden weights, pre-transposed
    # bh_ref  : (32, 1)     hidden bias (column)
    # wnt_ref : (1, 32)     output weights, pre-transposed
    # wnb_ref : (1, 1)      output bias
    # drop_ref: (1,) SMEM   dropprob (eval-mode scaling factor)
    # out_ref : (1, B)      lane-dense output
    C, B, L = x_ref.shape
    M = w1_ref.shape[0]
    K = w1_ref.shape[1] // C
    L1 = L - K + 1          # conv1 output length (stride=1, padding=0)
    L2 = L1 - K + 1         # conv2 output length

    x = x_ref[...]          # (C, B, L)
    drop = drop_ref[0]

    # ---- conv1: single im2col matmul for the whole batch --------------------
    # slab1[k*C + c, b, t] = x[c, b, t + k]
    slab1 = jnp.concatenate([x[:, :, k:k + L1] for k in range(K)],
                            axis=0)                              # (K*C, B, L1)
    conv1 = jnp.dot(w1_ref[...], slab1.reshape(K * C, B * L1),
                    preferred_element_type=jnp.float32)          # (M, B*L1)
    rect1 = jnp.maximum(conv1.reshape(M, B, L1)
                        + b1_ref[...].reshape(M, 1, 1), 0.0)     # clamp(min=0)

    # ---- conv2: single im2col matmul ----------------------------------------
    slab2 = jnp.concatenate([rect1[:, :, k:k + L2] for k in range(K)],
                            axis=0)                              # (K*M, B, L2)
    conv2 = jnp.dot(w2_ref[...], slab2.reshape(K * M, B * L2),
                    preferred_element_type=jnp.float32)          # (M, B*L2)
    rect2 = jnp.maximum(conv2.reshape(M, B, L2)
                        + b2_ref[...].reshape(M, 1, 1), 0.0)

    # ---- maxavg pooling, kept in (feature, batch) column layout (no .T) -----
    maxp = jnp.max(rect2, axis=-1)                               # (M, B)
    avgp = jnp.mean(rect2, axis=-1)                              # (M, B)
    pool = jnp.concatenate([maxp, avgp], axis=0)                 # (2M, B)

    # ---- hidden + output layers, one matmul each for the whole batch --------
    hid = jnp.maximum(jnp.dot(wht_ref[...], pool,
                              preferred_element_type=jnp.float32)
                      + bh_ref[...], 0.0)                        # (32, B)
    out = drop * jnp.dot(wnt_ref[...], hid,
                         preferred_element_type=jnp.float32) + wnb_ref[...]
    out_ref[...] = out.astype(out_ref.dtype)                     # one dense store
    # TODO(synk): training-mode bernoulli dropout mask path is not implemented;
    # only the eval ('test') branch of forward_pass is covered.


def convnet_forward(x, params, dropprob):
    B, C, L = x.shape
    M, _, K = params["wConv1"].shape

    # Wrapper-side layout plumbing (one-time, outside the kernel).
    x_cbl = jnp.transpose(x, (1, 0, 2))                               # (C, B, L)
    w1_flat = jnp.transpose(params["wConv1"], (0, 2, 1)).reshape(M, K * C)
    w2_flat = jnp.transpose(params["wConv2"], (0, 2, 1)).reshape(M, K * M)
    wh_t = params["wHidden"].T                                        # (32, 2M)
    bh_col = params["wHiddenBias"].reshape(32, 1)
    wn_t = params["wNeu"].T                                           # (1, 32)
    wnb = params["wNeuBias"].reshape(1, 1)
    drop = jnp.asarray([dropprob], jnp.float32)

    vmem = pl.BlockSpec(memory_space=pltpu.MemorySpace.VMEM)
    smem = pl.BlockSpec(memory_space=pltpu.MemorySpace.SMEM)

    # Everything fits in VMEM (KBs) -> single invocation, no grid / pipelining.
    # (For large B on v7x, add a 1-D batch grid with
    #  dimension_semantics=("parallel",) to use both TensorCores.)
    out = pl.pallas_call(
        convnet_kernel,
        out_shape=jax.ShapeDtypeStruct((1, B), jnp.float32),
        in_specs=[vmem] * 9 + [smem],
        out_specs=vmem,
    )(x_cbl, w1_flat, params["wRect1"], w2_flat, params["wRect2"],
      wh_t, bh_col, wn_t, wnb, drop)
    return out.reshape(B, 1)


def ref_forward(x, params, dropprob):
    """Pure-JAX reference mirroring the PyTorch forward (eval mode, maxavg)."""
    B, C, L = x.shape
    M, _, K = params["wConv1"].shape
    L1 = L - K + 1
    L2 = L1 - K + 1

    xw = jnp.stack([x[:, :, k:k + L1] for k in range(K)], axis=-1)   # (B,C,L1,K)
    conv1 = jnp.einsum("bctk,mck->bmt", xw, params["wConv1"])
    rect1 = jnp.maximum(conv1 + params["wRect1"].reshape(1, M, 1), 0.0)

    rw = jnp.stack([rect1[:, :, k:k + L2] for k in range(K)], axis=-1)
    conv2 = jnp.einsum("bctk,mck->bmt", rw, params["wConv2"])
    rect2 = jnp.maximum(conv2 + params["wRect2"].reshape(1, M, 1), 0.0)

    maxp = jnp.max(rect2, axis=2)
    avgp = jnp.mean(rect2, axis=2)
    pool = jnp.concatenate([maxp, avgp], axis=1)                     # (B, 2M)

    hid = jnp.maximum(pool @ params["wHidden"] + params["wHiddenBias"][0], 0.0)
    out = dropprob * (hid @ params["wNeu"]) + params["wNeuBias"]
    return out


def init_params(key, nummotif, motiflen):
    ks = jax.random.split(key, 8)

    def xavier(k, shape):
        # torch xavier_uniform_ convention for 3D: fan_in = C_in*K, fan_out = C_out*K
        if len(shape) == 3:
            fan_in, fan_out = shape[1] * shape[2], shape[0] * shape[2]
        else:
            fan_in, fan_out = shape[0], shape[1]
        bound = (6.0 / (fan_in + fan_out)) ** 0.5
        return jax.random.uniform(k, shape, jnp.float32, -bound, bound)

    M, K = nummotif, motiflen
    wConv1 = xavier(ks[0], (M, 4, K))
    wRect1 = -jax.random.normal(ks[1], (M,), jnp.float32)
    wConv2 = xavier(ks[2], (M, M, K))
    wRect2 = -jax.random.normal(ks[3], (M,), jnp.float32)
    wHidden = 0.3 * jax.random.normal(ks[4], (2 * M, 32), jnp.float32)
    wHiddenBias = 0.3 * jax.random.normal(ks[5], (32,), jnp.float32)
    wNeu_full = xavier(ks[6], (33, 1))
    wNeu, wNeuBias = wNeu_full[:32, :], wNeu_full[32:, :]            # (32,1), (1,1)

    return {
        "wConv1": wConv1,
        "wRect1": wRect1.reshape(M, 1),
        "wConv2": wConv2,
        "wRect2": wRect2.reshape(M, 1),
        "wHidden": wHidden,
        "wHiddenBias": wHiddenBias.reshape(1, 32),
        "wNeu": wNeu,
        "wNeuBias": wNeuBias,
    }


if __name__ == "__main__":
    B, C, L = 2, 4, 32          # small DNA-like input: batch=2, 4 channels, length 32
    nummotif, motiflen = 16, 5
    dropprob = 0.5

    key = jax.random.PRNGKey(0)
    kx, kp = jax.random.split(key)
    x = jax.random.normal(kx, (B, C, L), jnp.float32)
    params = init_params(kp, nummotif, motiflen)

    out = convnet_forward(x, params, dropprob)
    out = jax.block_until_ready(out)

    ref = ref_forward(x, params, dropprob)
    assert out.shape == (B, 1)
    assert jnp.allclose(out, ref, rtol=1e-4, atol=1e-4), (out, ref)

    print("KERNEL_OK")
</pallas_src>

<mosaic_0001>
module attributes {stable_mosaic.version = 11 : i64} {
  func.func @convnet_kernel(%arg0: memref<4x2x32xf32, #tpu.memory_space<vmem>>, %arg1: memref<16x20xf32, #tpu.memory_space<vmem>>, %arg2: memref<16x1xf32, #tpu.memory_space<vmem>>, %arg3: memref<16x80xf32, #tpu.memory_space<vmem>>, %arg4: memref<16x1xf32, #tpu.memory_space<vmem>>, %arg5: memref<32x32xf32, #tpu.memory_space<vmem>>, %arg6: memref<32x1xf32, #tpu.memory_space<vmem>>, %arg7: memref<1x32xf32, #tpu.memory_space<vmem>>, %arg8: memref<1x1xf32, #tpu.memory_space<vmem>>, %arg9: memref<1xf32, #tpu.memory_space<smem>>, %arg10: memref<1x2xf32, #tpu.memory_space<vmem>>) attributes {dimension_semantics = [], scalar_prefetch = 0 : i64, scratch_operands = 0 : i64, tpu.core_type = #tpu.core_type<tc>} {
    %c0 = arith.constant 0 : index
    %c0_0 = arith.constant 0 : index
    %c0_1 = arith.constant 0 : index
    %0 = vector.load %arg0[%c0, %c0_0, %c0_1] : memref<4x2x32xf32, #tpu.memory_space<vmem>>, vector<4x2x32xf32>
    %c0_2 = arith.constant 0 : index
    %1 = memref.load %arg9[%c0_2] : memref<1xf32, #tpu.memory_space<smem>>
    %2 = vector.extract_strided_slice %0 {offsets = [0, 0, 0], sizes = [4, 2, 28], strides = [1, 1, 1]} : vector<4x2x32xf32> to vector<4x2x28xf32>
    %3 = vector.extract_strided_slice %0 {offsets = [0, 0, 1], sizes = [4, 2, 28], strides = [1, 1, 1]} : vector<4x2x32xf32> to vector<4x2x28xf32>
    %4 = vector.extract_strided_slice %0 {offsets = [0, 0, 2], sizes = [4, 2, 28], strides = [1, 1, 1]} : vector<4x2x32xf32> to vector<4x2x28xf32>
    %5 = vector.extract_strided_slice %0 {offsets = [0, 0, 3], sizes = [4, 2, 28], strides = [1, 1, 1]} : vector<4x2x32xf32> to vector<4x2x28xf32>
    %6 = vector.extract_strided_slice %0 {offsets = [0, 0, 4], sizes = [4, 2, 28], strides = [1, 1, 1]} : vector<4x2x32xf32> to vector<4x2x28xf32>
    %7 = tpu.concatenate %2, %3, %4, %5, %6 in 0 : vector<4x2x28xf32>, vector<4x2x28xf32>, vector<4x2x28xf32>, vector<4x2x28xf32>, vector<4x2x28xf32> -> vector<20x2x28xf32>
    %c0_3 = arith.constant 0 : index
    %c0_4 = arith.constant 0 : index
    %8 = vector.load %arg1[%c0_3, %c0_4] : memref<16x20xf32, #tpu.memory_space<vmem>>, vector<16x20xf32>
    %9 = vector.shape_cast %7 : vector<20x2x28xf32> to vector<20x56xf32>
    %cst = arith.constant dense<0.000000e+00> : vector<16x56xf32>
    %10 = tpu.matmul %8, %9, %cst {dimension_numbers = #tpu.dot_dimension_numbers<[1], [0], [0], [1], [0, 0, 1, 1], [], []>} : vector<16x20xf32>, vector<20x56xf32>, vector<16x56xf32> -> vector<16x56xf32>
    %11 = vector.shape_cast %10 : vector<16x56xf32> to vector<16x2x28xf32>
    %c0_5 = arith.constant 0 : index
    %c0_6 = arith.constant 0 : index
    %12 = vector.load %arg2[%c0_5, %c0_6] : memref<16x1xf32, #tpu.memory_space<vmem>>, vector<16x1xf32>
    %13 = vector.shape_cast %12 : vector<16x1xf32> to vector<16x1x1xf32>
    %14 = vector.broadcast %13 : vector<16x1x1xf32> to vector<16x2x28xf32>
    %15 = arith.addf %11, %14 : vector<16x2x28xf32>
    %cst_7 = arith.constant 0.000000e+00 : f32
    %16 = vector.broadcast %cst_7 : f32 to vector<16x2x28xf32>
    %17 = arith.maximumf %15, %16 : vector<16x2x28xf32>
    %18 = vector.extract_strided_slice %17 {offsets = [0, 0, 0], sizes = [16, 2, 24], strides = [1, 1, 1]} : vector<16x2x28xf32> to vector<16x2x24xf32>
    %19 = vector.extract_strided_slice %17 {offsets = [0, 0, 1], sizes = [16, 2, 24], strides = [1, 1, 1]} : vector<16x2x28xf32> to vector<16x2x24xf32>
    %20 = vector.extract_strided_slice %17 {offsets = [0, 0, 2], sizes = [16, 2, 24], strides = [1, 1, 1]} : vector<16x2x28xf32> to vector<16x2x24xf32>
    %21 = vector.extract_strided_slice %17 {offsets = [0, 0, 3], sizes = [16, 2, 24], strides = [1, 1, 1]} : vector<16x2x28xf32> to vector<16x2x24xf32>
    %22 = vector.extract_strided_slice %17 {offsets = [0, 0, 4], sizes = [16, 2, 24], strides = [1, 1, 1]} : vector<16x2x28xf32> to vector<16x2x24xf32>
    %23 = tpu.concatenate %18, %19, %20, %21, %22 in 0 : vector<16x2x24xf32>, vector<16x2x24xf32>, vector<16x2x24xf32>, vector<16x2x24xf32>, vector<16x2x24xf32> -> vector<80x2x24xf32>
    %c0_8 = arith.constant 0 : index
    %c0_9 = arith.constant 0 : index
    %24 = vector.load %arg3[%c0_8, %c0_9] : memref<16x80xf32, #tpu.memory_space<vmem>>, vector<16x80xf32>
    %25 = vector.shape_cast %23 : vector<80x2x24xf32> to vector<80x48xf32>
    %cst_10 = arith.constant dense<0.000000e+00> : vector<16x48xf32>
    %26 = tpu.matmul %24, %25, %cst_10 {dimension_numbers = #tpu.dot_dimension_numbers<[1], [0], [0], [1], [0, 0, 1, 1], [], []>} : vector<16x80xf32>, vector<80x48xf32>, vector<16x48xf32> -> vector<16x48xf32>
    %27 = vector.shape_cast %26 : vector<16x48xf32> to vector<16x2x24xf32>
    %c0_11 = arith.constant 0 : index
    %c0_12 = arith.constant 0 : index
    %28 = vector.load %arg4[%c0_11, %c0_12] : memref<16x1xf32, #tpu.memory_space<vmem>>, vector<16x1xf32>
    %29 = vector.shape_cast %28 : vector<16x1xf32> to vector<16x1x1xf32>
    %30 = vector.broadcast %29 : vector<16x1x1xf32> to vector<16x2x24xf32>
    %31 = arith.addf %27, %30 : vector<16x2x24xf32>
    %cst_13 = arith.constant 0.000000e+00 : f32
    %32 = vector.broadcast %cst_13 : f32 to vector<16x2x24xf32>
    %33 = arith.maximumf %31, %32 : vector<16x2x24xf32>
    %cst_14 = arith.constant dense<0xFF800000> : vector<16x2xf32>
    %34 = vector.multi_reduction <maximumf>, %33, %cst_14 [2] : vector<16x2x24xf32> to vector<16x2xf32>
    %cst_15 = arith.constant dense<0.000000e+00> : vector<16x2xf32>
    %35 = vector.multi_reduction <add>, %33, %cst_15 [2] : vector<16x2x24xf32> to vector<16x2xf32>
    %cst_16 = arith.constant 2.400000e+01 : f32
    %36 = vector.broadcast %cst_16 : f32 to vector<16x2xf32>
    %37 = arith.divf %35, %36 : vector<16x2xf32>
    %38 = tpu.concatenate %34, %37 in 0 : vector<16x2xf32>, vector<16x2xf32> -> vector<32x2xf32>
    %c0_17 = arith.constant 0 : index
    %c0_18 = arith.constant 0 : index
    %39 = vector.load %arg5[%c0_17, %c0_18] : memref<32x32xf32, #tpu.memory_space<vmem>>, vector<32x32xf32>
    %cst_19 = arith.constant dense<0.000000e+00> : vector<32x2xf32>
    %40 = tpu.matmul %39, %38, %cst_19 {dimension_numbers = #tpu.dot_dimension_numbers<[1], [0], [0], [1], [0, 0, 1, 1], [], []>} : vector<32x32xf32>, vector<32x2xf32>, vector<32x2xf32> -> vector<32x2xf32>
    %c0_20 = arith.constant 0 : index
    %c0_21 = arith.constant 0 : index
    %41 = vector.load %arg6[%c0_20, %c0_21] : memref<32x1xf32, #tpu.memory_space<vmem>>, vector<32x1xf32>
    %42 = vector.broadcast %41 : vector<32x1xf32> to vector<32x2xf32>
    %43 = arith.addf %40, %42 : vector<32x2xf32>
    %cst_22 = arith.constant 0.000000e+00 : f32
    %44 = vector.broadcast %cst_22 : f32 to vector<32x2xf32>
    %45 = arith.maximumf %43, %44 : vector<32x2xf32>
    %c0_23 = arith.constant 0 : index
    %c0_24 = arith.constant 0 : index
    %46 = vector.load %arg7[%c0_23, %c0_24] : memref<1x32xf32, #tpu.memory_space<vmem>>, vector<1x32xf32>
    %cst_25 = arith.constant dense<0.000000e+00> : vector<1x2xf32>
    %47 = tpu.matmul %46, %45, %cst_25 {dimension_numbers = #tpu.dot_dimension_numbers<[1], [0], [0], [1], [0, 0, 1, 1], [], []>} : vector<1x32xf32>, vector<32x2xf32>, vector<1x2xf32> -> vector<1x2xf32>
    %48 = vector.broadcast %1 : f32 to vector<1x2xf32>
    %49 = arith.mulf %48, %47 : vector<1x2xf32>
    %c0_26 = arith.constant 0 : index
    %c0_27 = arith.constant 0 : index
    %50 = vector.load %arg8[%c0_26, %c0_27] : memref<1x1xf32, #tpu.memory_space<vmem>>, vector<1x1xf32>
    %51 = vector.broadcast %50 : vector<1x1xf32> to vector<1x2xf32>
    %52 = arith.addf %49, %51 : vector<1x2xf32>
    %c0_28 = arith.constant 0 : index
    %c0_29 = arith.constant 0 : index
    %53 = vector.load %arg10[%c0_28, %c0_29] : memref<1x2xf32, #tpu.memory_space<vmem>>, vector<1x2xf32>
    tpu.vector_store %arg10[%c0_28, %c0_29], %52 {strides = array<i32>} : memref<1x2xf32, #tpu.memory_space<vmem>>, vector<1x2xf32>,
    return
  }
}

</mosaic_0001>

<bundles_post_ra>
// kernel: tpu_custom_call.1
= control target key start
LH: loop header
LB: loop body
LE: loop exit
PB: predicated region body
PF: predicated region fallthrough
CT: control target
= control target key end

     0   :  { %s3676_s0 = inlined_call_operand.vmem [shape: f32[4,2,32], index: 0, kind: input, shape index: {}]   ;;  %s3677_s1 = inlined_call_operand.vmem [shape: f32[16,20], index: 1, kind: input, shape index: {}]   ;;  %s3678_s2 = inlined_call_operand.vmem [shape: f32[16,1], index: 2, kind: input, shape index: {}]   ;;  %s3679_s3 = inlined_call_operand.vmem [shape: f32[16,80], index: 3, kind: input, shape index: {}]   ;;  %s3680_s4 = inlined_call_operand.vmem [shape: f32[16,1], index: 4, kind: input, shape index: {}]   ;;  %s3681_s5 = inlined_call_operand.vmem [shape: f32[32,32], index: 5, kind: input, shape index: {}]   ;;  %s3682_s6 = inlined_call_operand.vmem [shape: f32[32,1], index: 6, kind: input, shape index: {}]   ;;  %s3683_s7 = inlined_call_operand.vmem [shape: f32[1,32], index: 7, kind: input, shape index: {}]   ;;  %s3684_s8 = inlined_call_operand.<no memory space> [shape: f32[1,1], index: 8, kind: input, shape index: {}]   ;;  %s3685_s9 = inlined_call_operand.<no memory space> [shape: f32[1], index: 9, kind: input, shape index: {}]   ;;  %s3686_s10 = inlined_call_operand.hbm [shape: f32[1,2], index: 10, kind: output, shape index: {}]  }
   0x1   :  { %v15_v0 = vstv %s3684_s8 }
   0x2   :  { %16 = vst [vmem:[#allocation2] sm:$0x1] %v15_v0 }
   0x3   :  { %v41_v1 = vld [vmem:[%s3676_s0 + $0x4] sm:$0x3]  ;;  %v39_v2 = vld [vmem:[%s3676_s0] sm:$0x3]  ;;  %v102_v3 = vlaneseq  ;;  %s2733_s19 = smov 127  }
   0x4   :  { %52 = vrot.lane.b32.xlu1 %v41_v1, %s2733_s19  ;;  %48 = vrot.lane.b32.xlu0 %v39_v2, %s2733_s19  ;;  %v98_v4 = vcombine.low %v39_v2, %v41_v1  ;;  %v42_v5 = vld [vmem:[%s3676_s0 + $0x6] sm:$0x3]  ;;  %v40_v6 = vld [vmem:[%s3676_s0 + $0x2] sm:$0x3]  ;;  %v2734_v8 = vmov 1983009808  }
   0x5   :  { %v106_v7 = vcombine.low %v40_v6, %v42_v5  ;;  %v100_v9 = vunpack.c.l.s4 %v2734_v8  ;;  %v2822_v10 = vshrl.u32 %v102_v3, 7 }
   0x6   :  { %18 = vsyncpa [#allocation5], 0  ;;  %s2735_s23 = smov 126   ;;  %s2736_s0 = smov 125   ;;  %v2738_v16 = vmov 1934713408  }
   0x7   :  { %v101_v11 = vunpack.c.0.s8 %v100_v9  ;;  %s2737_s24 = smov 124   ;;  %v132_v17 = vunpack.c.l.s4 %v2738_v16  ;;  %v96_v61 = vld [vmem:[%s3677_s1] sm:$0xff]  ;;  %vm239_vm0 = vcmask 162816   ;;  %s2740_s27 = smov 28   ;;  %vm235_vm1 = vcmask 228352  }
   0x8   :  { %54 = vrot.lane.b32.xlu1 %v42_v5, %s2733_s19  ;;  %50 = vrot.lane.b32.xlu0 %v40_v6, %s2733_s19  ;;  %vm246_vm2 = vcmask 1043456   ;;  %s2743_s13 = smov 100   ;;  %vm1477_vm3 = vcmask 195584   ;;  %vm1488_vm4 = vcmask 654336   ;;  %s2745_s21 = smov 104   ;;  %vm1972_vm5 = vcmask 189440  }
   0x9   :  { %v2827_v12 = vsub.s32 %v101_v11, %v2822_v10  ;;  %v133_v20 = vunpack.c.0.s8 %v132_v17  ;;  %2566 = vmatprep.mubr.msk.f32.mxu0 %vm239_vm0, %v96_v61  ;;  %v2742_v11 = vmov 0.0   ;;  %vm2315_vm6 = vcmask 261120   ;;  %s2748_s15 = smov [#allocation4]  }
   0xa   :  { %vm2168_vm7 = vcmask 1041409   ;;  %vm2170_vm8 = vcmask 1042434   ;;  %vm2172_vm9 = vcmask 1043459   ;;  %vm2174_vm10 = vcmask 1044484   ;;  %s2512_s16 = sshll.u32 %s2748_s15, 4  ;;  %s2513_s16 = int_to_ptr.vmem [resolvable:$true] %s2512_s16 }
   0xb   :  { %v105_v13 = vrot.slane %v98_v4, %v2827_v12  ;;  %v113_v14 = vrot.slane %v106_v7, %v2827_v12  ;;  %v2844_v24 = vsub.s32 %v133_v20, %v2822_v10  ;;  %v2741_v4 = vmov 1966171168   ;;  %v465_v7 = vld [vmem:[%s3678_s2] sm:$0xff]  ;;  %s2709_s17 = scalar_lea.vmem %s2513_s16, 16  ;;  %p2714_p1 = scmp.lt.s32.totalorder %s2513_s16, %s2513_s16 }
   0xc   :  { %62 = vrot.lane.b32.xlu1 %v40_v6, %s2735_s23  ;;  %60 = vrot.lane.b32.xlu0 %v39_v2, %s2735_s23  ;;  %v469_v9 = vcombine.high %v465_v7, %v465_v7  ;;  %vm2176_vm11 = vcmask 1045509   ;;  %vm2178_vm12 = vcmask 1046534   ;;  %vm2180_vm13 = vcmask 1047559   ;;  %p2710_p0 = scmp.ne.s32.totalorder %s2513_s16, %s2709_s17 }
   0xd   :  { %v130_v15 = vcombine.low %v105_v13, %v113_v14  ;;  %vm2747_vm14 = vmmov 0   ;;  %vm2504_vm15 = vcmask 8192  }
   0xf   :  { %v2849_v31 = vrot.slane %v130_v15, %v2844_v24 }
  0x10   :  { %66 = vrot.lane.b32.xlu1 %v42_v5, %s2735_s23  ;;  %64 = vrot.lane.b32.xlu0 %v41_v1, %s2735_s23 }
  0x14   :  { %74 = vrot.lane.b32.xlu1 %v40_v6, %s2736_s0  ;;  %72 = vrot.lane.b32.xlu0 %v39_v2, %s2736_s0 }
  0x18   :  { %78 = vrot.lane.b32.xlu1 %v42_v5, %s2736_s0  ;;  %76 = vrot.lane.b32.xlu0 %v41_v1, %s2736_s0 }
  0x1c   :  { %86 = vrot.lane.b32.xlu1 %v40_v6, %s2737_s24  ;;  %84 = vrot.lane.b32.xlu0 %v39_v2, %s2737_s24 }
  0x20   :  { %90 = vrot.lane.b32.xlu1 %v42_v5, %s2737_s24  ;;  %88 = vrot.lane.b32.xlu0 %v41_v1, %s2737_s24  ;;  %v2739_v1 = vmov 0   ;;  %v471_v5 = vunpack.c.l.s4 %v2741_v4 }
  0x21   :  { %2677 = vset.pattern.permute.xlu1 %v2739_v1  ;;  %2676 = vset.pattern.permute.xlu0 %v2739_v1 }
  0x22   :  { %v472_v8 = vunpack.c.0.s8 %v471_v5 }
  0x24   :  { %v2887_v14 = vsub.s32 %v472_v8, %v2822_v10 }
  0x26   :  { %v476_v15 = vrot.slane %v465_v7, %v2887_v14  ;;  %v483_v16 = vrot.slane %v469_v9, %v2887_v14 }
  0x28   :  { %v484_v17 = vcombine.high %v476_v15, %v476_v15  ;;  %v485_v20 = vcombine.high %v483_v16, %v483_v16 }
  0x76   :  { %v53_v18 = vpop.permute.xlu1 %52  ;;  %v49_v19 = vpop.permute.xlu0 %48 }
  0x77   :  { %v114_v21 = vcombine.low %v49_v19, %v53_v18  ;;  %v2892_v18 = vsub.s32 0, %v2822_v10  ;;  %v492_v19 = vrot.slane %v476_v15, %v2887_v14  ;;  %v97_v15 = vld [vmem:[%s3677_s1 + $0x8] sm:$0xff]  ;;  %s2744_s1 = smov 24  }
  0x79   :  { %v121_v26 = vrot.slane %v114_v21, %v2827_v12  ;;  %v506_v21 = vrot.slane %v484_v17, %v2887_v14 }
  0x7a   :  { %v55_v22 = vpop.permute.xlu1 %54  ;;  %v51_v23 = vpop.permute.xlu0 %50 }
  0x7b   :  { %v122_v25 = vcombine.low %v51_v23, %v55_v22  ;;  %v514_v22 = vcombine.high %v492_v19, %v492_v19  ;;  %v570_v23 = vrot.slane %v492_v19, %v2892_v18 }
  0x7d   :  { %v129_v27 = vrot.slane %v122_v25, %v2827_v12  ;;  %v574_v25 = vrot.slane %v506_v21, %v2892_v18 }
  0x7e   :  { %v63_v28 = vpop.permute.xlu1 %62  ;;  %v61_v29 = vpop.permute.xlu0 %60 }
  0x7f   :  { %v138_v30 = vcombine.low %v121_v26, %v129_v27  ;;  %v466_v26 = vld [vmem:[%s3678_s2 + $0x8] sm:$0xff]  ;;  %v516_v27 = vcombine.high %v506_v21, %v506_v21 }
  0x81   :  { %v2852_v32 = vrot.slane %v138_v30, %v2844_v24  ;;  %v499_v30 = vrot.slane %v483_v16, %v2887_v14 }
  0x82   :  { %v67_v33 = vpop.permute.xlu1 %66  ;;  %v65_v34 = vpop.permute.xlu0 %64 }
  0x83   :  { %v146_v35 = vcombine.low %v2849_v31, %v2852_v32  ;;  %v156_v36 = vcombine.low %v63_v28, %v67_v33  ;;  %v148_v37 = vcombine.low %v61_v29, %v65_v34  ;;  %v147_v56 = vcombine.high %v2849_v31, %v2852_v32 }
  0x84   :  { %v513_v28 = vrot.slane %v485_v20, %v2887_v14  ;;  %v578_v29 = vrot.slane %v514_v22, %v2892_v18  ;;  %v525_v33 = vrot.slane %v466_v26, %v2887_v14  ;;  %v582_v34 = vrot.slane %v516_v27, %v2892_v18 }
  0x85   :  { %v163_v40 = vrot.slane %v156_v36, %v2827_v12  ;;  %v155_v41 = vrot.slane %v148_v37, %v2827_v12 }
  0x86   :  { %v75_v38 = vpop.permute.xlu1 %74  ;;  %v73_v39 = vpop.permute.xlu0 %72  ;;  %v590_v36 = vrot.slane %v513_v28, %v2892_v18  ;;  %v517_v37 = vcombine.high %v513_v28, %v513_v28 }
  0x87   :  { %v180_v46 = vcombine.low %v155_v41, %v163_v40  ;;  %v515_v40 = vcombine.high %v499_v30, %v499_v30  ;;  %v518_v41 = vcombine.high %v466_v26, %v466_v26 }
  0x89   :  { %v2861_v52 = vrot.slane %v180_v46, %v2844_v24  ;;  %v532_v46 = vrot.slane %v518_v41, %v2887_v14 }
  0x8a   :  { %v79_v42 = vpop.permute.xlu1 %78  ;;  %v77_v43 = vpop.permute.xlu0 %76 }
  0x8b   :  { %v172_v44 = vcombine.low %v75_v38, %v79_v42  ;;  %v164_v45 = vcombine.low %v73_v39, %v77_v43  ;;  %v533_v38 = vcombine.high %v525_v33, %v525_v33  ;;  %v586_v39 = vrot.slane %v499_v30, %v2892_v18 }
  0x8c   :  { %v598_v42 = vrot.slane %v517_v37, %v2892_v18 }
  0x8d   :  { %v179_v47 = vrot.slane %v172_v44, %v2827_v12  ;;  %v171_v48 = vrot.slane %v164_v45, %v2827_v12  ;;  %v555_v43 = vrot.slane %v533_v38, %v2887_v14  ;;  %v594_v44 = vrot.slane %v515_v40, %v2892_v18 }
  0x8e   :  { %v87_v49 = vpop.permute.xlu1 %86  ;;  %v85_v50 = vpop.permute.xlu0 %84  ;;  %v541_v45 = vrot.slane %v525_v33, %v2887_v14 }
  0x8f   :  { %v188_v51 = vcombine.low %v171_v48, %v179_v47  ;;  %v606_v47 = vrot.slane %v555_v43, %v2892_v18  ;;  %v565_v48 = vcombine.high %v555_v43, %v555_v43 }
  0x91   :  { %v2864_v53 = vrot.slane %v188_v51, %v2844_v24  ;;  %v563_v51 = vcombine.high %v541_v45, %v541_v45 }
  0x92   :  { %v91_v54 = vpop.permute.xlu1 %90  ;;  %v89_v55 = vpop.permute.xlu0 %88 }
  0x93   :  { %v206_v57 = vcombine.low %v87_v49, %v91_v54  ;;  %v198_v58 = vcombine.low %v85_v50, %v89_v55  ;;  %v197_v59 = vcombine.high %v2861_v52, %v2864_v53  ;;  %v196_v60 = vcombine.low %v2861_v52, %v2864_v53 }
  0x94   :  { %v534_v49 = vcombine.high %v532_v46, %v532_v46  ;;  %v602_v50 = vrot.slane %v541_v45, %v2892_v18  ;;  %v614_v54 = vrot.slane %v565_v48, %v2892_v18 }
  0x95   :  { %v213_v62 = vrot.slane %v206_v57, %v2827_v12  ;;  %v205_v63 = vrot.slane %v198_v58, %v2827_v12  ;;  %v2671_v0 = vpack.i.bf16 %v197_v59, %v147_v56  ;;  %v610_v56 = vrot.slane %v563_v51, %v2892_v18 }
  0x96   :  { %v562_v55 = vrot.slane %v534_v49, %v2887_v14  ;;  %v548_v57 = vrot.slane %v532_v46, %v2887_v14 }
  0x97   :  { %v214_v2 = vcombine.low %v205_v63, %v213_v62  ;;  %2672 = vrot.lane.b32.xlu0 %v2671_v0, %s2740_s27 }
  0x98   :  { %v622_v58 = vrot.slane %v562_v55, %v2892_v18  ;;  %v566_v59 = vcombine.high %v562_v55, %v562_v55  ;;  %v618_v61 = vrot.slane %v548_v57, %v2892_v18  ;;  %v564_v62 = vcombine.high %v548_v57, %v548_v57 }
  0x99   :  { %v2879_v6 = vrot.slane %v214_v2, %v2844_v24 }
  0x9a   :  { %v630_v63 = vrot.slane %v566_v59, %v2892_v18  ;;  %v626_v0 = vrot.slane %v564_v62, %v2892_v18 }
  0x9b   :  { %v222_v13 = vcombine.high %v2879_v6, %v2742_v11  ;;  %632 = vperm.xlu0 %2676, %v570_v23  }
  0x9d   :  { %230 = vrot.lane.b32.xlu1 %v222_v13, %s2740_s27 }
  0x9f   :  { %644 = vperm.xlu0 %2676, %v582_v34  }
  0xa1   :  { %636 = vperm.xlu1 %2677, %v574_v25  }
  0xa3   :  { %652 = vperm.xlu0 %2676, %v590_v36  }
  0xa5   :  { %640 = vperm.xlu1 %2677, %v578_v29  }
  0xa7   :  { %660 = vperm.xlu0 %2676, %v598_v42  }
  0xa9   :  { %648 = vperm.xlu1 %2677, %v586_v39  }
  0xab   :  { %668 = vperm.xlu0 %2676, %v606_v47  }
  0xad   :  { %656 = vperm.xlu1 %2677, %v594_v44  }
  0xaf   :  { %676 = vperm.xlu0 %2676, %v614_v54  }
  0xb1   :  { %664 = vperm.xlu1 %2677, %v602_v50  }
  0xb3   :  { %684 = vperm.xlu0 %2676, %v622_v58  }
  0xb5   :  { %672 = vperm.xlu1 %2677, %v610_v56  }
  0xb7   :  { %692 = vperm.xlu0 %2676, %v630_v63  }
  0xb9   :  { %680 = vperm.xlu1 %2677, %v618_v61  }
  0xbd   :  { %688 = vperm.xlu1 %2677, %v626_v0  }
 0x109   :  { %v2673_v1 = vpop.permute.xlu0 %2672 }
 0x10a   :  { %v2675_v2 = vunpack.i.h.bf16 %v2673_v1  ;;  %v2674_v4 = vunpack.i.l.bf16 %v2673_v1 }
 0x10c   :  { %v236_v5 = vsel %vm235_vm1, %v146_v35, %v2674_v4  ;;  %v237_v7 = vsel %vm235_vm1, %v196_v60, %v2675_v2 }
 0x10d   :  { %v2617_v8 = vpack.c.bf16 %v237_v7, %v236_v5 }
 0x10f   :  { %v231_v9 = vpop.permute.xlu1 %230  ;;  %2618 = vmatprep.subr.bf16.mxu0 %v2617_v8 }
 0x110   :  { %v238_v13 = vsel %vm235_vm1, %v2879_v6, %v231_v9  ;;  %2620 = vmatpush3.bf16.msra.mxu0 %v2617_v8 }
 0x111   :  { %2564 = vmatprep.subr.msk.mxu0 %vm246_vm2, %v238_v13 }
 0x114   :  { %2565 = vmatpush3.msk.msra.mxu0 %vm246_vm2, %v238_v13 }
 0x115   :  { %2567 = vmatmul.mubr.msk.f32.vlgmr.msra.gmra.mrb[0].mxu0 %vm239_vm0, %v97_v15 }
 0x11a   :  { %v633_v52 = vpop.permute.xlu0 %632 }
 0x11e   :  { %v2936_v60 = vpop.permute.xlu0 %644 }
 0x120   :  { %v2934_v35 = vpop.permute.xlu1 %636 }
 0x122   :  { %v2938_v16 = vpop.permute.xlu0 %652 }
 0x124   :  { %v641_v53 = vpop.permute.xlu1 %640 }
 0x126   :  { %v2940_v19 = vpop.permute.xlu0 %660 }
 0x128   :  { %v649_v6 = vpop.permute.xlu1 %648 }
 0x12a   :  { %v669_v21 = vpop.permute.xlu0 %668 }
 0x12c   :  { %v657_v17 = vpop.permute.xlu1 %656 }
 0x12e   :  { %v677_v23 = vpop.permute.xlu0 %676 }
 0x130   :  { %v665_v20 = vpop.permute.xlu1 %664 }
 0x132   :  { %v685_v26 = vpop.permute.xlu0 %684 }
 0x134   :  { %v673_v22 = vpop.permute.xlu1 %672 }
 0x136   :  { %v2942_v28 = vpop.permute.xlu0 %692 }
 0x138   :  { %v681_v25 = vpop.permute.xlu1 %680 }
 0x13c   :  { %v689_v27 = vpop.permute.xlu1 %688 }
 0x1e8   :  { %v2568_v31 = vpop.f32.mrb[0].mxu0 }
 0x1e9   :  { %329 = vrot.lane.b32.xlu1 %v2568_v31, %s2743_s13  ;;  %v316_v32 = vpop.f32.mrb[1].mxu0  ;;  %v399_v29 = vcombine.high %v2568_v31, %v2742_v11  ;;  %v406_v34 = vrot.slane %v2568_v31, %v2827_v12 }
 0x1ea   :  { %327 = vrot.lane.b32.xlu0 %v316_v32, %s2743_s13  ;;  %v333_v30 = vcombine.high %v316_v32, %v2742_v11  ;;  %v340_v39 = vrot.slane %v316_v32, %v2827_v12 }
 0x1eb   :  { %v413_v42 = vrot.slane %v399_v29, %v2827_v12 }
 0x1ec   :  { %v347_v46 = vrot.slane %v333_v30, %v2827_v12 }
 0x25b   :  { %v330_v33 = vpop.permute.xlu1 %329 }
 0x25c   :  { %v414_v36 = vcombine.high %v330_v33, %v2742_v11  ;;  %v421_v37 = vrot.slane %v330_v33, %v2827_v12  ;;  %v328_v38 = vpop.permute.xlu0 %327 }
 0x25d   :  { %v348_v40 = vcombine.high %v328_v38, %v2742_v11  ;;  %v355_v41 = vrot.slane %v328_v38, %v2827_v12 }
 0x25e   :  { %v428_v43 = vrot.slane %v414_v36, %v2827_v12  ;;  %v429_v44 = vcombine.low %v406_v34, %v421_v37  ;;  %v430_v45 = vcombine.high %v406_v34, %v421_v37 }
 0x25f   :  { %v362_v47 = vrot.slane %v348_v40, %v2827_v12  ;;  %v363_v48 = vcombine.low %v340_v39, %v355_v41  ;;  %v364_v49 = vcombine.high %v340_v39, %v355_v41 }
 0x260   :  { %v437_v50 = vrot.slane %v429_v44, %v2844_v24  ;;  %v444_v51 = vrot.slane %v430_v45, %v2844_v24  ;;  %v445_v54 = vcombine.low %v413_v42, %v428_v43  ;;  %v446_v55 = vcombine.high %v413_v42, %v428_v43 }
 0x261   :  { %v371_v56 = vrot.slane %v363_v48, %v2844_v24  ;;  %v378_v57 = vrot.slane %v364_v49, %v2844_v24  ;;  %v379_v58 = vcombine.low %v347_v46, %v362_v47  ;;  %v380_v59 = vcombine.high %v347_v46, %v362_v47 }
 0x262   :  { %v453_v61 = vrot.slane %v445_v54, %v2844_v24  ;;  %v460_v62 = vrot.slane %v446_v55, %v2844_v24  ;;  %v461_v63 = vcombine.high %v437_v50, %v2742_v11  ;;  %v462_v0 = vcombine.high %v444_v51, %v2742_v11 }
 0x263   :  { %v703_v1 = vadd.f32 %v665_v20, %v437_v50  ;;  %v705_v2 = vadd.f32 %v673_v22, %v444_v51  ;;  %v387_v4 = vrot.slane %v379_v58, %v2844_v24  ;;  %v394_v5 = vrot.slane %v380_v59, %v2844_v24 }
 0x264   :  { %v463_v7 = vcombine.high %v453_v61, %v2742_v11  ;;  %v464_v8 = vcombine.high %v460_v62, %v2742_v11  ;;  %v704_v9 = vadd.f32 %v669_v21, %v461_v63  ;;  %v706_v13 = vadd.f32 %v677_v23, %v462_v0 }
 0x265   :  { %v707_v15 = vadd.f32 %v681_v25, %v453_v61  ;;  %v709_v31 = vadd.f32 %v689_v27, %v460_v62  ;;  %v2968_v32 = vmax.f32 %v703_v1, 0.0  ;;  %v2970_v29 = vmax.f32 %v705_v2, 0.0 }
 0x266   :  { %v395_v30 = vcombine.high %v371_v56, %v2742_v11  ;;  %v396_v20 = vcombine.high %v378_v57, %v2742_v11  ;;  %v397_v22 = vcombine.high %v387_v4, %v2742_v11  ;;  %v398_v33 = vcombine.high %v394_v5, %v2742_v11 }
 0x267   :  { %v695_v34 = vadd.f32 %v633_v52, %v371_v56  ;;  %v697_v36 = vadd.f32 %v641_v53, %v378_v57  ;;  %v699_v37 = vadd.f32 %v649_v6, %v387_v4  ;;  %v701_v38 = vadd.f32 %v657_v17, %v394_v5  ;;  %759 = vrot.lane.b32.xlu1 %v2968_v32, %s2733_s19 }
 0x268   :  { %v696_v21 = vadd.f32 %v2934_v35, %v395_v30  ;;  %v698_v23 = vadd.f32 %v2936_v60, %v396_v20  ;;  %v720_v25 = vmax.f32 %v704_v9, 0.0  ;;  %v722_v27 = vmax.f32 %v706_v13, 0.0 }
 0x269   :  { %v2980_v39 = vmax.f32 %v695_v34, 0.0  ;;  %v2982_v40 = vmax.f32 %v697_v36, 0.0  ;;  %v2984_v41 = vmax.f32 %v707_v15, 0.0  ;;  %v708_v42 = vadd.f32 %v685_v26, %v463_v7 }
 0x26a   :  { %761 = vrot.lane.b32.xlu0 %v720_v25, %s2733_s19  ;;  %v2987_v52 = vmax.f32 %v696_v21, 0.0  ;;  %v2989_v53 = vmax.f32 %v698_v23, 0.0  ;;  %v2991_v6 = vmax.f32 %v709_v31, 0.0  ;;  %v710_v35 = vadd.f32 %v2942_v28, %v464_v8 }
 0x26b   :  { %763 = vrot.lane.b32.xlu1 %v2970_v29, %s2733_s19  ;;  %v2996_v60 = vmax.f32 %v708_v42, 0.0  ;;  %v2998_v17 = vmax.f32 %v699_v37, 0.0  ;;  %v700_v43 = vadd.f32 %v2938_v16, %v397_v22  ;;  %v3001_v26 = vmax.f32 %v701_v38, 0.0 }
 0x26c   :  { %v3003_v44 = vmax.f32 %v710_v35, 0.0  ;;  %v702_v45 = vadd.f32 %v2940_v19, %v398_v33  ;;  %v937_v46 = vcombine.low %v2980_v39, %v2982_v40  ;;  %v945_v28 = vcombine.low %v2987_v52, %v2989_v53 }
 0x26d   :  { %v3010_v47 = vmax.f32 %v700_v43, 0.0  ;;  %v953_v48 = vcombine.low %v2998_v17, %v3001_v26  ;;  %v987_v16 = vcombine.low %v2968_v32, %v2970_v29  ;;  %v995_v49 = vcombine.low %v720_v25, %v722_v27 }
 0x26e   :  { %765 = vrot.lane.b32.xlu0 %v722_v27, %s2733_s19  ;;  %v3017_v50 = vmax.f32 %v702_v45, 0.0  ;;  %v944_v19 = vrot.slane %v937_v46, %v2827_v12  ;;  %v952_v51 = vrot.slane %v945_v28, %v2827_v12  ;;  %v1003_v54 = vcombine.low %v2984_v41, %v2991_v6 }
 0x26f   :  { %807 = vrot.lane.b32.xlu1 %v2968_v32, %s2735_s23  ;;  %v994_v55 = vrot.slane %v987_v16, %v2827_v12  ;;  %v1002_v56 = vrot.slane %v995_v49, %v2827_v12  ;;  %v1011_v57 = vcombine.low %v2996_v60, %v3003_v44  ;;  %v960_v0 = vrot.slane %v953_v48, %v2827_v12 }
 0x270   :  { %v961_v58 = vcombine.low %v3010_v47, %v3017_v50  ;;  %v969_v59 = vcombine.low %v944_v19, %v952_v51  ;;  %v1010_v61 = vrot.slane %v1003_v54, %v2827_v12 }
 0x271   :  { %v1018_v62 = vrot.slane %v1011_v57, %v2827_v12  ;;  %v1019_v63 = vcombine.low %v994_v55, %v1002_v56 }
 0x272   :  { %809 = vrot.lane.b32.xlu0 %v720_v25, %s2735_s23  ;;  %v968_v1 = vrot.slane %v961_v58, %v2827_v12  ;;  %v3046_v8 = vrot.slane %v969_v59, %v2844_v24 }
 0x273   :  { %811 = vrot.lane.b32.xlu1 %v2970_v29, %s2735_s23  ;;  %v1027_v2 = vcombine.low %v1010_v61, %v1018_v62  ;;  %v3039_v5 = vrot.slane %v1019_v63, %v2844_v24 }
 0x274   :  { %v977_v4 = vcombine.low %v960_v0, %v968_v1 }
 0x275   :  { %v3042_v7 = vrot.slane %v1027_v2, %v2844_v24 }
 0x276   :  { %813 = vrot.lane.b32.xlu0 %v722_v27, %s2735_s23  ;;  %v3049_v9 = vrot.slane %v977_v4, %v2844_v24 }
 0x277   :  { %855 = vrot.lane.b32.xlu1 %v2968_v32, %s2736_s0  ;;  %v1036_v13 = vcombine.high %v3039_v5, %v3042_v7  ;;  %v1035_v15 = vcombine.low %v3039_v5, %v3042_v7 }
 0x278   :  { %v986_v31 = vcombine.high %v3046_v8, %v3049_v9  ;;  %v985_v30 = vcombine.low %v3046_v8, %v3049_v9  ;;  %v935_v9 = vld [vmem:[%s3679_s3] sm:$0xff] }
 0x279   :  { %2589 = vmatprep.mubr.msk.f32.mxu1 %vm1488_vm4, %v935_v9 }
 0x27a   :  { %857 = vrot.lane.b32.xlu0 %v720_v25, %s2736_s0  ;;  %v2678_v20 = vpack.i.bf16 %v1036_v13, %v986_v31 }
 0x27b   :  { %859 = vrot.lane.b32.xlu1 %v2970_v29, %s2736_s0 }
 0x27e   :  { %861 = vrot.lane.b32.xlu0 %v722_v27, %s2736_s0 }
 0x27f   :  { %903 = vrot.lane.b32.xlu1 %v2968_v32, %s2737_s24 }
 0x282   :  { %905 = vrot.lane.b32.xlu0 %v720_v25, %s2737_s24 }
 0x283   :  { %907 = vrot.lane.b32.xlu1 %v2970_v29, %s2737_s24 }
 0x286   :  { %909 = vrot.lane.b32.xlu0 %v722_v27, %s2737_s24 }
 0x287   :  { %743 = vrot.lane.b32.xlu1 %v2980_v39, %s2733_s19 }
 0x28a   :  { %745 = vrot.lane.b32.xlu0 %v2987_v52, %s2733_s19 }
 0x28b   :  { %747 = vrot.lane.b32.xlu1 %v2982_v40, %s2733_s19 }
 0x28e   :  { %749 = vrot.lane.b32.xlu0 %v2989_v53, %s2733_s19 }
 0x28f   :  { %791 = vrot.lane.b32.xlu1 %v2980_v39, %s2735_s23 }
 0x292   :  { %793 = vrot.lane.b32.xlu0 %v2987_v52, %s2735_s23 }
 0x293   :  { %795 = vrot.lane.b32.xlu1 %v2982_v40, %s2735_s23 }
 0x296   :  { %797 = vrot.lane.b32.xlu0 %v2989_v53, %s2735_s23 }
 0x297   :  { %839 = vrot.lane.b32.xlu1 %v2980_v39, %s2736_s0 }
 0x29a   :  { %841 = vrot.lane.b32.xlu0 %v2987_v52, %s2736_s0 }
 0x29b   :  { %843 = vrot.lane.b32.xlu1 %v2982_v40, %s2736_s0 }
 0x29e   :  { %845 = vrot.lane.b32.xlu0 %v2989_v53, %s2736_s0 }
 0x29f   :  { %887 = vrot.lane.b32.xlu1 %v2980_v39, %s2737_s24 }
 0x2a2   :  { %889 = vrot.lane.b32.xlu0 %v2987_v52, %s2737_s24 }
 0x2a3   :  { %891 = vrot.lane.b32.xlu1 %v2982_v40, %s2737_s24 }
 0x2a6   :  { %893 = vrot.lane.b32.xlu0 %v2989_v53, %s2737_s24 }
 0x2a7   :  { %767 = vrot.lane.b32.xlu1 %v2984_v41, %s2733_s19 }
 0x2aa   :  { %769 = vrot.lane.b32.xlu0 %v2996_v60, %s2733_s19 }
 0x2ab   :  { %771 = vrot.lane.b32.xlu1 %v2991_v6, %s2733_s19 }
 0x2ae   :  { %773 = vrot.lane.b32.xlu0 %v3003_v44, %s2733_s19 }
 0x2af   :  { %815 = vrot.lane.b32.xlu1 %v2984_v41, %s2735_s23 }
 0x2b2   :  { %817 = vrot.lane.b32.xlu0 %v2996_v60, %s2735_s23 }
 0x2b3   :  { %819 = vrot.lane.b32.xlu1 %v2991_v6, %s2735_s23 }
 0x2b6   :  { %821 = vrot.lane.b32.xlu0 %v3003_v44, %s2735_s23 }
 0x2b7   :  { %863 = vrot.lane.b32.xlu1 %v2984_v41, %s2736_s0 }
 0x2ba   :  { %865 = vrot.lane.b32.xlu0 %v2996_v60, %s2736_s0 }
 0x2bb   :  { %867 = vrot.lane.b32.xlu1 %v2991_v6, %s2736_s0 }
 0x2be   :  { %869 = vrot.lane.b32.xlu0 %v3003_v44, %s2736_s0 }
 0x2bf   :  { %911 = vrot.lane.b32.xlu1 %v2984_v41, %s2737_s24 }
 0x2c2   :  { %913 = vrot.lane.b32.xlu0 %v2996_v60, %s2737_s24 }
 0x2c3   :  { %751 = vrot.lane.b32.xlu1 %v2998_v17, %s2733_s19 }
 0x2c6   :  { %753 = vrot.lane.b32.xlu0 %v3010_v47, %s2733_s19 }
 0x2c7   :  { %755 = vrot.lane.b32.xlu1 %v3001_v26, %s2733_s19 }
 0x2ca   :  { %757 = vrot.lane.b32.xlu0 %v3017_v50, %s2733_s19 }
 0x2cb   :  { %799 = vrot.lane.b32.xlu1 %v2998_v17, %s2735_s23 }
 0x2ce   :  { %801 = vrot.lane.b32.xlu0 %v3010_v47, %s2735_s23 }
 0x2cf   :  { %803 = vrot.lane.b32.xlu1 %v3001_v26, %s2735_s23 }
 0x2d2   :  { %805 = vrot.lane.b32.xlu0 %v3017_v50, %s2735_s23 }
 0x2d3   :  { %847 = vrot.lane.b32.xlu1 %v2998_v17, %s2736_s0 }
 0x2d6   :  { %849 = vrot.lane.b32.xlu0 %v3010_v47, %s2736_s0 }
 0x2d7   :  { %851 = vrot.lane.b32.xlu1 %v3001_v26, %s2736_s0 }
 0x2d9   :  { %v760_v32 = vpop.permute.xlu1 %759 }
 0x2da   :  { %853 = vrot.lane.b32.xlu0 %v3017_v50, %s2736_s0 }
 0x2db   :  { %895 = vrot.lane.b32.xlu1 %v2998_v17, %s2737_s24 }
 0x2dc   :  { %v762_v29 = vpop.permute.xlu0 %761 }
 0x2dd   :  { %v764_v22 = vpop.permute.xlu1 %763 }
 0x2de   :  { %897 = vrot.lane.b32.xlu0 %v3010_v47, %s2737_s24  ;;  %v1087_v58 = vcombine.low %v760_v32, %v764_v22 }
 0x2df   :  { %899 = vrot.lane.b32.xlu1 %v3001_v26, %s2737_s24 }
 0x2e0   :  { %v766_v33 = vpop.permute.xlu0 %765  ;;  %v1094_v1 = vrot.slane %v1087_v58, %v2827_v12 }
 0x2e1   :  { %v3161_v34 = vpop.permute.xlu1 %807  ;;  %v1095_v54 = vcombine.low %v762_v29, %v766_v33 }
 0x2e2   :  { %901 = vrot.lane.b32.xlu0 %v3017_v50, %s2737_s24 }
 0x2e3   :  { %915 = vrot.lane.b32.xlu1 %v2991_v6, %s2737_s24  ;;  %v1102_v62 = vrot.slane %v1095_v54, %v2827_v12 }
 0x2e4   :  { %v810_v36 = vpop.permute.xlu0 %809 }
 0x2e5   :  { %v812_v37 = vpop.permute.xlu1 %811  ;;  %v1119_v13 = vcombine.low %v1094_v1, %v1102_v62 }
 0x2e6   :  { %917 = vrot.lane.b32.xlu0 %v3003_v44, %s2737_s24  ;;  %v1187_v32 = vcombine.low %v3161_v34, %v812_v37 }
 0x2e7   :  { %2679 = vrot.lane.b32.xlu1 %v2678_v20, %s2744_s1 }
 0x2e8   :  { %v814_v38 = vpop.permute.xlu0 %813 }
 0x2e9   :  { %v3170_v21 = vpop.permute.xlu1 %855  ;;  %v1195_v31 = vcombine.low %v810_v36, %v814_v38  ;;  %v1194_v36 = vrot.slane %v1187_v32, %v2827_v12 }
 0x2ec   :  { %v3172_v23 = vpop.permute.xlu0 %857 }
 0x2ed   :  { %v3174_v25 = vpop.permute.xlu1 %859 }
 0x2ee   :  { %v1287_v62 = vcombine.low %v3170_v21, %v3174_v25 }
 0x2f0   :  { %v3176_v27 = vpop.permute.xlu0 %861 }
 0x2f1   :  { %v3178_v39 = vpop.permute.xlu1 %903  ;;  %v1295_v37 = vcombine.low %v3172_v23, %v3176_v27  ;;  %v1294_v27 = vrot.slane %v1287_v62, %v2827_v12 }
 0x2f4   :  { %v3180_v40 = vpop.permute.xlu0 %905 }
 0x2f5   :  { %v3182_v41 = vpop.permute.xlu1 %907 }
 0x2f8   :  { %v3184_v42 = vpop.permute.xlu0 %909 }
 0x2f9   :  { %v3186_v52 = vpop.permute.xlu1 %743 }
 0x2fc   :  { %v3188_v53 = vpop.permute.xlu0 %745 }
 0x2fd   :  { %v3190_v6 = vpop.permute.xlu1 %747 }
 0x300   :  { %v3192_v35 = vpop.permute.xlu0 %749 }
 0x301   :  { %v3194_v60 = vpop.permute.xlu1 %791 }
 0x304   :  { %v3196_v17 = vpop.permute.xlu0 %793 }
 0x305   :  { %v3198_v43 = vpop.permute.xlu1 %795 }
 0x308   :  { %v3200_v26 = vpop.permute.xlu0 %797 }
 0x309   :  { %v3202_v44 = vpop.permute.xlu1 %839 }
 0x30c   :  { %v3204_v45 = vpop.permute.xlu0 %841 }
 0x30d   :  { %v3206_v46 = vpop.permute.xlu1 %843 }
 0x310   :  { %v3208_v28 = vpop.permute.xlu0 %845 }
 0x311   :  { %v888_v47 = vpop.permute.xlu1 %887 }
 0x314   :  { %v890_v48 = vpop.permute.xlu0 %889 }
 0x315   :  { %v892_v16 = vpop.permute.xlu1 %891 }
 0x316   :  { %v1337_v49 = vcombine.low %v888_v47, %v892_v16  ;;  %v1202_v16 = vrot.slane %v1195_v31, %v2827_v12 }
 0x318   :  { %v894_v50 = vpop.permute.xlu0 %893  ;;  %v3211_v55 = vrot.slane %v1337_v49, %v2827_v12  ;;  %v1219_v34 = vcombine.low %v1194_v36, %v1202_v16 }
 0x319   :  { %v1345_v19 = vcombine.low %v890_v48, %v894_v50  ;;  %v768_v51 = vpop.permute.xlu1 %767  ;;  %v3224_v48 = vrot.slane %v1119_v13, %v2844_v24 }
 0x31a   :  { %v3240_v1 = vrot.slane %v1219_v34, %v2844_v24 }
 0x31b   :  { %v3214_v56 = vrot.slane %v1345_v19, %v2827_v12 }
 0x31c   :  { %v770_v57 = vpop.permute.xlu0 %769 }
 0x31d   :  { %v1369_v59 = vcombine.low %v3211_v55, %v3214_v56  ;;  %v772_v61 = vpop.permute.xlu1 %771 }
 0x31e   :  { %v1103_v63 = vcombine.low %v768_v51, %v772_v61 }
 0x320   :  { %v774_v0 = vpop.permute.xlu0 %773  ;;  %v1110_v20 = vrot.slane %v1103_v63, %v2827_v12 }
 0x321   :  { %v1111_v2 = vcombine.low %v770_v57, %v774_v0  ;;  %v816_v4 = vpop.permute.xlu1 %815 }
 0x323   :  { %v1118_v29 = vrot.slane %v1111_v2, %v2827_v12  ;;  %v1302_v2 = vrot.slane %v1295_v37, %v2827_v12 }
 0x324   :  { %v818_v33 = vpop.permute.xlu0 %817 }
 0x325   :  { %v1127_v22 = vcombine.low %v1110_v20, %v1118_v29  ;;  %v820_v47 = vpop.permute.xlu1 %819  ;;  %v1319_v21 = vcombine.low %v1294_v27, %v1302_v2 }
 0x326   :  { %v1203_v50 = vcombine.low %v816_v4, %v820_v47 }
 0x327   :  { %v3228_v49 = vrot.slane %v1127_v22, %v2844_v24  ;;  %v3256_v16 = vrot.slane %v1319_v21, %v2844_v24 }
 0x328   :  { %v822_v19 = vpop.permute.xlu0 %821  ;;  %v1210_v57 = vrot.slane %v1203_v50, %v2827_v12  ;;  %v1045_v50 = vcombine.low %v3188_v53, %v3192_v35  ;;  %v1145_v53 = vcombine.low %v3196_v17, %v3200_v26 }
 0x329   :  { %v1135_v38 = vcombine.low %v3224_v48, %v3228_v49  ;;  %v1211_v51 = vcombine.low %v818_v33, %v822_v19  ;;  %v864_v54 = vpop.permute.xlu1 %863 }
 0x32a   :  { %v1052_v37 = vrot.slane %v1045_v50, %v2827_v12  ;;  %v1152_v27 = vrot.slane %v1145_v53, %v2827_v12 }
 0x32b   :  { %v1218_v58 = vrot.slane %v1211_v51, %v2827_v12  ;;  %v1037_v51 = vcombine.low %v3186_v52, %v3190_v6  ;;  %v1137_v6 = vcombine.low %v3194_v60, %v3198_v43 }
 0x32c   :  { %v866_v61 = vpop.permute.xlu0 %865 }
 0x32d   :  { %v1227_v63 = vcombine.low %v1210_v57, %v1218_v58  ;;  %v868_v0 = vpop.permute.xlu1 %867  ;;  %v1144_v26 = vrot.slane %v1137_v6, %v2827_v12 }
 0x32e   :  { %v1303_v13 = vcombine.low %v864_v54, %v868_v0 }
 0x32f   :  { %v3244_v4 = vrot.slane %v1227_v63, %v2844_v24  ;;  %v1169_v50 = vcombine.low %v1144_v26, %v1152_v27 }
 0x330   :  { %v870_v23 = vpop.permute.xlu0 %869  ;;  %v1310_v25 = vrot.slane %v1303_v13, %v2827_v12 }
 0x331   :  { %v1235_v31 = vcombine.low %v3240_v1, %v3244_v4  ;;  %v1311_v20 = vcombine.low %v866_v61, %v870_v23  ;;  %v3249_v29 = vpop.permute.xlu1 %911  ;;  %v1044_v61 = vrot.slane %v1037_v51, %v2827_v12 }
 0x333   :  { %v1318_v33 = vrot.slane %v1311_v20, %v2827_v12  ;;  %v1069_v35 = vcombine.low %v1044_v61, %v1052_v37 }
 0x334   :  { %v3253_v32 = vpop.permute.xlu0 %913 }
 0x335   :  { %v1327_v22 = vcombine.low %v1310_v25, %v1318_v33  ;;  %v752_v47 = vpop.permute.xlu1 %751  ;;  %v3277_v20 = vrot.slane %v1069_v35, %v2844_v24  ;;  %v1136_v33 = vcombine.high %v3224_v48, %v3228_v49 }
 0x337   :  { %v3261_v19 = vrot.slane %v1327_v22, %v2844_v24 }
 0x338   :  { %v754_v36 = vpop.permute.xlu0 %753 }
 0x339   :  { %v1335_v54 = vcombine.low %v3256_v16, %v3261_v19  ;;  %v756_v34 = vpop.permute.xlu1 %755 }
 0x33a   :  { %v1053_v57 = vcombine.low %v752_v47, %v756_v34 }
 0x33c   :  { %v758_v58 = vpop.permute.xlu0 %757  ;;  %v1060_v0 = vrot.slane %v1053_v57, %v2827_v12  ;;  %v1237_v57 = vcombine.low %v3202_v44, %v3206_v46  ;;  %v1236_v44 = vcombine.high %v3240_v1, %v3244_v4 }
 0x33d   :  { %v1061_v62 = vcombine.low %v754_v36, %v758_v58  ;;  %v800_v63 = vpop.permute.xlu1 %799  ;;  %v1245_v36 = vcombine.low %v3204_v45, %v3208_v28 }
 0x33e   :  { %v1244_v35 = vrot.slane %v1237_v57, %v2827_v12 }
 0x33f   :  { %v1068_v52 = vrot.slane %v1061_v62, %v2827_v12  ;;  %v1252_v53 = vrot.slane %v1245_v36, %v2827_v12 }
 0x340   :  { %v802_v2 = vpop.permute.xlu0 %801 }
 0x341   :  { %v1077_v13 = vcombine.low %v1060_v0, %v1068_v52  ;;  %v804_v23 = vpop.permute.xlu1 %803 }
 0x342   :  { %v1153_v17 = vcombine.low %v800_v63, %v804_v23  ;;  %v3297_v63 = vrot.slane %v1169_v50, %v2844_v24  ;;  %v1269_v23 = vcombine.low %v1244_v35, %v1252_v53  ;;  %v1395_v50 = vcombine.low %v3180_v40, %v3184_v42 }
 0x343   :  { %v3280_v21 = vrot.slane %v1077_v13, %v2844_v24  ;;  %v3313_v13 = vld [vmem:[%s3680_s4] sm:$0xff] }
 0x344   :  { %v806_v25 = vpop.permute.xlu0 %805  ;;  %v1160_v51 = vrot.slane %v1153_v17, %v2827_v12  ;;  %v3328_v36 = vrot.slane %v1269_v23, %v2844_v24  ;;  %v1402_v35 = vrot.slane %v1395_v50, %v2827_v12  ;;  %v1714_v56 = vcombine.high %v3313_v13, %v3313_v13 }
 0x345   :  { %v1085_v60 = vcombine.low %v3277_v20, %v3280_v21  ;;  %v1086_v43 = vcombine.high %v3277_v20, %v3280_v21  ;;  %v1161_v22 = vcombine.low %v802_v2, %v806_v25  ;;  %v848_v47 = vpop.permute.xlu1 %847 }
 0x347   :  { %v1168_v34 = vrot.slane %v1161_v22, %v2827_v12  ;;  %v2683_v37 = vpack.i.bf16 %v1136_v33, %v1086_v43  ;;  %v1721_v33 = vrot.slane %v3313_v13, %v2887_v14  ;;  %v1728_v13 = vrot.slane %v1714_v56, %v2887_v14 }
 0x348   :  { %v850_v58 = vpop.permute.xlu0 %849 }
 0x349   :  { %v1177_v61 = vcombine.low %v1160_v51, %v1168_v34  ;;  %2684 = vrot.lane.b32.xlu0 %v2683_v37, %s2744_s1  ;;  %v852_v62 = vpop.permute.xlu1 %851  ;;  %v1387_v37 = vcombine.low %v3178_v39, %v3182_v41  ;;  %v1729_v23 = vcombine.high %v1721_v33, %v1721_v33 }
 0x34a   :  { %v1253_v28 = vcombine.low %v848_v47, %v852_v62  ;;  %v3323_v47 = vld [vmem:[%s3680_s4 + $0x8] sm:$0xff]  ;;  %v1336_v62 = vcombine.high %v3256_v16, %v3261_v19 }
 0x34b   :  { %v3301_v45 = vrot.slane %v1177_v61, %v2844_v24  ;;  %v1770_v61 = vrot.slane %v3323_v47, %v2887_v14  ;;  %v1751_v55 = vrot.slane %v1729_v23, %v2887_v14  ;;  %v936_v16 = vld [vmem:[%s3679_s3 + $0x8] sm:$0xff] }
 0x34c   :  { %v854_v0 = vpop.permute.xlu0 %853  ;;  %v1260_v27 = vrot.slane %v1253_v28, %v2827_v12 }
 0x34d   :  { %v1185_v46 = vcombine.low %v3297_v63, %v3301_v45  ;;  %v1186_v52 = vcombine.high %v3297_v63, %v3301_v45  ;;  %v1261_v6 = vcombine.low %v850_v58, %v854_v0  ;;  %v896_v2 = vpop.permute.xlu1 %895  ;;  %v1737_v58 = vrot.slane %v1721_v33, %v2887_v14 }
 0x34f   :  { %v1268_v17 = vrot.slane %v1261_v6, %v2827_v12  ;;  %v2688_v26 = vpack.i.bf16 %v1236_v44, %v1186_v52  ;;  %v1394_v52 = vrot.slane %v1387_v37, %v2827_v12 }
 0x350   :  { %v898_v25 = vpop.permute.xlu0 %897 }
 0x351   :  { %v1277_v43 = vcombine.low %v1260_v27, %v1268_v17  ;;  %2689 = vrot.lane.b32.xlu1 %v2688_v26, %s2744_s1  ;;  %v900_v22 = vpop.permute.xlu1 %899 }
 0x352   :  { %v1353_v34 = vcombine.low %v896_v2, %v900_v22  ;;  %v1815_v2 = vrot.slane %v1737_v58, %v2892_v18 }
 0x353   :  { %v3331_v51 = vrot.slane %v1277_v43, %v2844_v24  ;;  %v1419_v43 = vcombine.low %v1394_v52, %v1402_v35 }
 0x354   :  { %v902_v57 = vpop.permute.xlu0 %901  ;;  %v1360_v39 = vrot.slane %v1353_v34, %v2827_v12  ;;  %v3357_v34 = vrot.slane %v1369_v59, %v2844_v24 }
 0x355   :  { %v1285_v40 = vcombine.low %v3328_v36, %v3331_v51  ;;  %v1286_v42 = vcombine.high %v3328_v36, %v3331_v51  ;;  %v1361_v53 = vcombine.low %v898_v25, %v902_v57  ;;  %v916_v28 = vpop.permute.xlu1 %915  ;;  %v1786_v25 = vrot.slane %v1770_v61, %v2887_v14 }
 0x356   :  { %v1403_v0 = vcombine.low %v3249_v29, %v916_v28  ;;  %v1759_v29 = vcombine.high %v1737_v58, %v1737_v58  ;;  %v3382_v5 = vrot.slane %v1419_v43, %v2844_v24 }
 0x357   :  { %v1368_v41 = vrot.slane %v1361_v53, %v2827_v12  ;;  %v2693_v44 = vpack.i.bf16 %v1336_v62, %v1286_v42  ;;  %v1847_v8 = vrot.slane %v1786_v25, %v2892_v18 }
 0x358   :  { %v918_v6 = vpop.permute.xlu0 %917 }
 0x359   :  { %v1377_v27 = vcombine.low %v1360_v39, %v1368_v41  ;;  %v1411_v17 = vcombine.low %v3253_v32, %v918_v6  ;;  %2694 = vrot.lane.b32.xlu0 %v2693_v44, %s2744_s1  ;;  %v2680_v26 = vpop.permute.xlu1 %2679  ;;  %v1410_v32 = vrot.slane %v1403_v0, %v2827_v12  ;;  %v1778_v39 = vcombine.high %v1770_v61, %v1770_v61 }
 0x35a   :  { %v2682_v22 = vunpack.i.h.bf16 %v2680_v26  ;;  %v2681_v50 = vunpack.i.l.bf16 %v2680_v26  ;;  %v1744_v0 = vrot.slane %v1728_v13, %v2887_v14  ;;  %v1730_v44 = vcombine.high %v1728_v13, %v1728_v13 }
 0x35b   :  { %v3360_v33 = vrot.slane %v1377_v27, %v2844_v24  ;;  %v1418_v37 = vrot.slane %v1411_v17, %v2827_v12  ;;  %v1819_v6 = vrot.slane %v1751_v55, %v2892_v18  ;;  %v1808_v17 = vcombine.high %v1786_v25, %v1786_v25 }
 0x35c   :  { %v1478_v57 = vsel %vm1477_vm3, %v985_v30, %v2681_v50  ;;  %v1479_v58 = vsel %vm1477_vm3, %v1035_v15, %v2682_v22  ;;  %v1823_v15 = vrot.slane %v1759_v29, %v2892_v18  ;;  %v1761_v30 = vcombine.high %v1751_v55, %v1751_v55 }
 0x35d   :  { %v1385_v59 = vcombine.low %v3357_v34, %v3360_v33  ;;  %v1427_v62 = vcombine.low %v1410_v32, %v1418_v37  ;;  %1877 = vperm.xlu0 %2676, %v1815_v2   ;;  %v2621_v42 = vpack.c.bf16 %v1479_v58, %v1478_v57  ;;  %v1386_v53 = vcombine.high %v3357_v34, %v3360_v33 }
 0x35e   :  { %v1827_v52 = vrot.slane %v1761_v30, %v2892_v18  ;;  %v1800_v2 = vrot.slane %v1778_v39, %v2887_v14  ;;  %v1831_v23 = vrot.slane %v1744_v0, %v2892_v18  ;;  %v1758_v27 = vrot.slane %v1730_v44, %v2887_v14 }
 0x35f   :  { %v3385_v7 = vrot.slane %v1427_v62, %v2844_v24  ;;  %2622 = vmatprep.subr.bf16.mxu1 %v2621_v42  ;;  %v1763_v26 = vcombine.high %v3323_v47, %v3323_v47  ;;  %v1760_v22 = vcombine.high %v1744_v0, %v1744_v0  ;;  %v1855_v50 = vrot.slane %v1808_v17, %v2892_v18 }
 0x360   :  { %2624 = vmatpush3.bf16.msra.mxu1 %v2621_v42  ;;  %v1851_v61 = vrot.slane %v1800_v2, %v2892_v18  ;;  %v1835_v43 = vrot.slane %v1758_v27, %v2892_v18  ;;  %v1810_v29 = vcombine.high %v1800_v2, %v1800_v2  ;;  %v1762_v57 = vcombine.high %v1758_v27, %v1758_v27 }
 0x361   :  { %v1435_v28 = vcombine.low %v3382_v5, %v3385_v7  ;;  %v1436_v35 = vcombine.high %v3382_v5, %v3385_v7  ;;  %1909 = vperm.xlu0 %2676, %v1847_v8   ;;  %v1777_v32 = vrot.slane %v1763_v26, %v2887_v14  ;;  %v1839_v37 = vrot.slane %v1760_v22, %v2892_v18 }
 0x362   :  { %v1859_v25 = vrot.slane %v1810_v29, %v2892_v18  ;;  %v1843_v55 = vrot.slane %v1762_v57, %v2892_v18 }
 0x363   :  { %v2698_v41 = vpack.i.bf16 %v1436_v35, %v1386_v53  ;;  %v1793_v58 = vrot.slane %v1777_v32, %v2887_v14  ;;  %v1779_v47 = vcombine.high %v1777_v32, %v1777_v32 }
 0x365   :  { %1885 = vperm.xlu0 %2676, %v1823_v15   ;;  %2699 = vrot.lane.b32.xlu1 %v2698_v41, %s2744_s1  ;;  %v1863_v56 = vrot.slane %v1793_v58, %v2892_v18  ;;  %v1807_v62 = vrot.slane %v1779_v47, %v2887_v14  ;;  %v1809_v19 = vcombine.high %v1793_v58, %v1793_v58 }
 0x367   :  { %v1867_v42 = vrot.slane %v1807_v62, %v2892_v18  ;;  %v1871_v34 = vrot.slane %v1809_v19, %v2892_v18  ;;  %v1811_v33 = vcombine.high %v1807_v62, %v1807_v62 }
 0x369   :  { %1889 = vperm.xlu0 %2676, %v1827_v52   ;;  %1881 = vperm.xlu1 %2677, %v1819_v6  }
 0x36d   :  { %1893 = vperm.xlu0 %2676, %v1831_v23   ;;  %1913 = vperm.xlu1 %2677, %v1851_v61  }
 0x371   :  { %1897 = vperm.xlu0 %2676, %v1835_v43   ;;  %1917 = vperm.xlu1 %2677, %v1855_v50  }
 0x375   :  { %1901 = vperm.xlu0 %2676, %v1839_v37   ;;  %1921 = vperm.xlu1 %2677, %v1859_v25  }
 0x379   :  { %1905 = vperm.xlu0 %2676, %v1843_v55   ;;  %1925 = vperm.xlu1 %2677, %v1863_v56  }
 0x37d   :  { %1929 = vperm.xlu1 %2677, %v1867_v42  }
 0x3bb   :  { %v2685_v8 = vpop.permute.xlu0 %2684 }
 0x3bc   :  { %v2687_v9 = vunpack.i.h.bf16 %v2685_v8  ;;  %v2686_v15 = vunpack.i.l.bf16 %v2685_v8 }
 0x3be   :  { %v1480_v30 = vsel %vm1477_vm3, %v1085_v60, %v2686_v15  ;;  %v1481_v13 = vsel %vm1477_vm3, %v1135_v38, %v2687_v9 }
 0x3bf   :  { %v2625_v53 = vpack.c.bf16 %v1481_v13, %v1480_v30 }
 0x3c1   :  { %2626 = vmatprep.subr.bf16.mxu1 %v2625_v53 }
 0x3c2   :  { %2628 = vmatpush3.bf16.msra.mxu1 %v2625_v53 }
 0x3c3   :  { %v2690_v14 = vpop.permute.xlu1 %2689 }
 0x3c4   :  { %v2692_v35 = vunpack.i.h.bf16 %v2690_v14  ;;  %v2691_v39 = vunpack.i.l.bf16 %v2690_v14 }
 0x3c6   :  { %v1482_v41 = vsel %vm1477_vm3, %v1185_v46, %v2691_v39  ;;  %v1483_v20 = vsel %vm1477_vm3, %v1235_v31, %v2692_v35 }
 0x3c7   :  { %v2629_v21 = vpack.c.bf16 %v1483_v20, %v1482_v41 }
 0x3c9   :  { %2630 = vmatprep.subr.bf16.mxu1 %v2629_v21 }
 0x3ca   :  { %2632 = vmatpush3.bf16.msra.mxu1 %v2629_v21 }
 0x3cb   :  { %v2695_v48 = vpop.permute.xlu0 %2694 }
 0x3cc   :  { %v2697_v49 = vunpack.i.h.bf16 %v2695_v48  ;;  %v2696_v38 = vunpack.i.l.bf16 %v2695_v48 }
 0x3ce   :  { %v1484_v60 = vsel %vm1477_vm3, %v1285_v40, %v2696_v38  ;;  %v1485_v63 = vsel %vm1477_vm3, %v1335_v54, %v2697_v49 }
 0x3cf   :  { %v2633_v45 = vpack.c.bf16 %v1485_v63, %v1484_v60 }
 0x3d1   :  { %2634 = vmatprep.subr.bf16.mxu1 %v2633_v45 }
 0x3d2   :  { %2636 = vmatpush3.bf16.msra.mxu1 %v2633_v45 }
 0x3d7   :  { %v2700_v1 = vpop.permute.xlu1 %2699 }
 0x3d8   :  { %v2702_v4 = vunpack.i.h.bf16 %v2700_v1  ;;  %v2701_v31 = vunpack.i.l.bf16 %v2700_v1 }
 0x3da   :  { %v1486_v46 = vsel %vm1477_vm3, %v1385_v59, %v2701_v31  ;;  %v1487_v36 = vsel %vm1477_vm3, %v1435_v28, %v2702_v4  ;;  %v1875_v59 = vrot.slane %v1811_v33, %v2892_v18 }
 0x3db   :  { %v2637_v51 = vpack.c.bf16 %v1487_v36, %v1486_v46 }
 0x3dc   :  { %v1878_v5 = vpop.permute.xlu0 %1877 }
 0x3dd   :  { %2638 = vmatprep.subr.bf16.mxu1 %v2637_v51 }
 0x3de   :  { %2640 = vmatpush3.bf16.msra.mxu1 %v2637_v51 }
 0x3e0   :  { %v1910_v7 = vpop.permute.xlu0 %1909 }
 0x3e1   :  { %2590 = vmatmul.mubr.msk.f32.vlgmr.msra.gmra.mrb[0].mxu1 %vm1488_vm4, %v936_v16 }
 0x3e4   :  { %v1886_v0 = vpop.permute.xlu0 %1885 }
 0x3e8   :  { %v1882_v28 = vpop.permute.xlu1 %1881  ;;  %v3454_v52 = vpop.permute.xlu0 %1889 }
 0x3ec   :  { %v1914_v44 = vpop.permute.xlu1 %1913  ;;  %v3456_v2 = vpop.permute.xlu0 %1893 }
 0x3f0   :  { %v1918_v6 = vpop.permute.xlu1 %1917  ;;  %v3460_v27 = vpop.permute.xlu0 %1897 }
 0x3f4   :  { %v3458_v23 = vpop.permute.xlu1 %1921  ;;  %v3464_v17 = vpop.permute.xlu0 %1901 }
 0x3f8   :  { %v3462_v61 = vpop.permute.xlu1 %1925  ;;  %v3468_v43 = vpop.permute.xlu0 %1905 }
 0x3fc   :  { %v3466_v26 = vpop.permute.xlu1 %1929 }
 0x4b4   :  { %v2591_v54 = vpop.f32.mrb[0].mxu1 }
 0x4b5   :  { %1574 = vrot.lane.b32.xlu1 %v2591_v54, %s2745_s21  ;;  %v1561_v40 = vpop.f32.mrb[1].mxu1  ;;  %v1651_v50 = vrot.slane %v2591_v54, %v2827_v12  ;;  %v1644_v8 = vcombine.high %v2591_v54, %v2742_v11 }
 0x4b6   :  { %1572 = vrot.lane.b32.xlu0 %v1561_v40, %s2745_s21  ;;  %v1585_v37 = vrot.slane %v1561_v40, %v2827_v12  ;;  %v1578_v60 = vcombine.high %v1561_v40, %v2742_v11 }
 0x4b7   :  { %v1658_v39 = vrot.slane %v1644_v8, %v2827_v12 }
 0x4b8   :  { %v1592_v51 = vrot.slane %v1578_v60, %v2827_v12 }
 0x4b9   :  { %1933 = vperm.xlu1 %2677, %v1871_v34  }
 0x4bd   :  { %1937 = vperm.xlu1 %2677, %v1875_v59  }
 0x527   :  { %v1575_v22 = vpop.permute.xlu1 %1574 }
 0x528   :  { %v1666_v29 = vrot.slane %v1575_v22, %v2827_v12  ;;  %v1573_v32 = vpop.permute.xlu0 %1572  ;;  %v1659_v47 = vcombine.high %v1575_v22, %v2742_v11 }
 0x529   :  { %v1600_v57 = vrot.slane %v1573_v32, %v2827_v12  ;;  %v1593_v41 = vcombine.high %v1573_v32, %v2742_v11 }
 0x52a   :  { %v1674_v25 = vcombine.low %v1651_v50, %v1666_v29  ;;  %v1675_v58 = vcombine.high %v1651_v50, %v1666_v29  ;;  %v1673_v53 = vrot.slane %v1659_v47, %v2827_v12 }
 0x52b   :  { %v1608_v55 = vcombine.low %v1585_v37, %v1600_v57  ;;  %v1609_v56 = vcombine.high %v1585_v37, %v1600_v57  ;;  %v1607_v45 = vrot.slane %v1593_v41, %v2827_v12 }
 0x52c   :  { %v1682_v62 = vrot.slane %v1674_v25, %v2844_v24  ;;  %v1689_v42 = vrot.slane %v1675_v58, %v2844_v24  ;;  %v1691_v63 = vcombine.high %v1658_v39, %v1673_v53 }
 0x52d   :  { %v1616_v9 = vrot.slane %v1608_v55, %v2844_v24  ;;  %v1623_v15 = vrot.slane %v1609_v56, %v2844_v24  ;;  %v1624_v54 = vcombine.low %v1592_v51, %v1607_v45  ;;  %v1625_v58 = vcombine.high %v1592_v51, %v1607_v45 }
 0x52e   :  { %v1948_v30 = vadd.f32 %v1910_v7, %v1682_v62  ;;  %v1950_v13 = vadd.f32 %v1918_v6, %v1689_v42  ;;  %v1706_v1 = vcombine.high %v1682_v62, %v2742_v11  ;;  %v1705_v16 = vrot.slane %v1691_v63, %v2844_v24 }
 0x52f   :  { %v1942_v14 = vadd.f32 %v1886_v0, %v1623_v15  ;;  %v1940_v20 = vadd.f32 %v1878_v5, %v1616_v9  ;;  %v1640_v36 = vcombine.high %v1616_v9, %v2742_v11  ;;  %v1707_v34 = vcombine.high %v1689_v42, %v2742_v11 }
 0x530   :  { %v1964_v35 = vmax.f32 %v1948_v30, 0.0  ;;  %v1966_v49 = vmax.f32 %v1950_v13, 0.0  ;;  %v1949_v40 = vadd.f32 %v1914_v44, %v1706_v1  ;;  %v1641_v7 = vcombine.high %v1623_v15, %v2742_v11 }
 0x531   :  { %v1958_v38 = vmax.f32 %v1942_v14, 0.0  ;;  %v1956_v46 = vmax.f32 %v1940_v20, 0.0  ;;  %v3496_v5 = vadd.f32 %v1882_v28, %v1640_v36  ;;  %v1709_v12 = vcombine.high %v1705_v16, %v2742_v11 }
 0x532   :  { %v2045_v21 = vsel %vm1972_vm5, %v1964_v35, 0.0  ;;  %v1997_v48 = vsel %vm1972_vm5, %v1964_v35, -inf  ;;  %v2003_v4 = vsel %vm1972_vm5, %v1966_v49, -inf  ;;  %v2051_v33 = vsel %vm1972_vm5, %v1966_v49, 0.0 }
 0x533   :  { %2046 = vadd.xlane.f32.xlu1 %v2045_v21  ;;  %1998 = vmax.xlane.f32.xlu0 %v1997_v48  ;;  %v1979_v31 = vsel %vm1972_vm5, %v1958_v38, -inf  ;;  %v2021_v59 = vsel %vm1972_vm5, %v1956_v46, 0.0  ;;  %v1690_v0 = vcombine.low %v1658_v39, %v1673_v53  ;;  %v2027_v44 = vsel %vm1972_vm5, %v1958_v38, 0.0 }
 0x534   :  { %v1973_v50 = vsel %vm1972_vm5, %v1956_v46, -inf  ;;  %v1951_v29 = vadd.f32 %v3458_v23, %v1707_v34  ;;  %v1965_v32 = vmax.f32 %v1949_v40, 0.0  ;;  %v1957_v28 = vmax.f32 %v3496_v5, 0.0  ;;  %v2291_v5 = vld [vmem:[%s3682_s6] sm:$0xff] }
 0x535   :  { %v1943_v37 = vadd.f32 %v3454_v52, %v1641_v7  ;;  %v1632_v57 = vrot.slane %v1624_v54, %v2844_v24  ;;  %v1698_v55 = vrot.slane %v1690_v0, %v2844_v24  ;;  %v1639_v8 = vrot.slane %v1625_v58, %v2844_v24  ;;  %v2293_v7 = vld [vmem:[%s3682_s6 + $0x10] sm:$0xff]  ;;  %v2292_v0 = vld [vmem:[%s3682_s6 + $0x8] sm:$0xff] }
 0x536   :  { %v1967_v47 = vmax.f32 %v1951_v29, 0.0  ;;  %v2000_v23 = vsel %vm1972_vm5, %v1965_v32, -inf  ;;  %v1976_v62 = vsel %vm1972_vm5, %v1957_v28, -inf  ;;  %v2048_v53 = vsel %vm1972_vm5, %v1965_v32, 0.0 }
 0x537   :  { %2004 = vmax.xlane.f32.xlu0 %v2003_v4  ;;  %1980 = vmax.xlane.f32.xlu1 %v1979_v31  ;;  %v1959_v52 = vmax.f32 %v1943_v37, 0.0  ;;  %v1944_v42 = vadd.f32 %v3456_v2, %v1632_v57  ;;  %v1952_v13 = vadd.f32 %v3462_v61, %v1698_v55  ;;  %v1946_v2 = vadd.f32 %v3464_v17, %v1639_v8 }
 0x538   :  { %v1934_v19 = vpop.permute.xlu1 %1933  ;;  %v2006_v9 = vsel %vm1972_vm5, %v1967_v47, -inf  ;;  %v2054_v21 = vsel %vm1972_vm5, %v1967_v47, 0.0  ;;  %v1642_v49 = vcombine.high %v1632_v57, %v2742_v11  ;;  %v1643_v63 = vcombine.high %v1639_v8, %v2742_v11 }
 0x539   :  { %v1982_v15 = vsel %vm1972_vm5, %v1959_v52, -inf  ;;  %v1960_v30 = vmax.f32 %v1944_v42, 0.0  ;;  %v1968_v35 = vmax.f32 %v1952_v13, 0.0  ;;  %v1954_v39 = vadd.f32 %v1934_v19, %v1705_v16 }
 0x53a   :  { %v2030_v41 = vsel %vm1972_vm5, %v1959_v52, 0.0  ;;  %v1962_v20 = vmax.f32 %v1946_v2, 0.0  ;;  %v1945_v60 = vadd.f32 %v3460_v27, %v1642_v49  ;;  %v1947_v31 = vadd.f32 %v3468_v43, %v1643_v63 }
 0x53b   :  { %2052 = vadd.xlane.f32.xlu0 %v2051_v33  ;;  %2022 = vadd.xlane.f32.xlu1 %v2021_v59  ;;  %v1985_v14 = vsel %vm1972_vm5, %v1960_v30, -inf  ;;  %v2009_v24 = vsel %vm1972_vm5, %v1968_v35, -inf  ;;  %v1970_v61 = vmax.f32 %v1954_v39, 0.0  ;;  %v2033_v38 = vsel %vm1972_vm5, %v1960_v30, 0.0 }
 0x53c   :  { %v1938_v6 = vpop.permute.xlu1 %1937  ;;  %v1991_v48 = vsel %vm1972_vm5, %v1962_v20, -inf  ;;  %v2057_v45 = vsel %vm1972_vm5, %v1968_v35, 0.0  ;;  %v2039_v1 = vsel %vm1972_vm5, %v1962_v20, 0.0  ;;  %v1961_v4 = vmax.f32 %v1945_v60, 0.0 }
 0x53d   :  { %v3500_v22 = vadd.f32 %v1938_v6, %v1709_v12  ;;  %v2015_v17 = vsel %vm1972_vm5, %v1970_v61, -inf  ;;  %v1708_v46 = vcombine.high %v1698_v55, %v2742_v11  ;;  %v2063_v36 = vsel %vm1972_vm5, %v1970_v61, 0.0  ;;  %v2294_v12 = vld [vmem:[%s3682_s6 + $0x18] sm:$0xff]  ;;  %v2287_v6 = vld [vmem:[%s3681_s5] sm:$0xff] }
 0x53e   :  { %v1988_v51 = vsel %vm1972_vm5, %v1961_v4, -inf  ;;  %v1963_v27 = vmax.f32 %v1947_v31, 0.0  ;;  %v2024_v19 = vsel %vm1972_vm5, %v1957_v28, 0.0  ;;  %v2036_v34 = vsel %vm1972_vm5, %v1961_v4, 0.0  ;;  %2600 = vmatprep.mubr.msk.f32.mxu0 %vm2315_vm6, %v2287_v6 }
 0x53f   :  { %v1971_v25 = vmax.f32 %v3500_v22, 0.0  ;;  %2028 = vadd.xlane.f32.xlu1 %v2027_v44  ;;  %1974 = vmax.xlane.f32.xlu0 %v1973_v50  ;;  %v1953_v16 = vadd.f32 %v3466_v26, %v1708_v46  ;;  %v2493_v22 = vld [vmem:[#allocation2] sm:$0x1]  ;;  %v2103_v13 = vand.u32 127, %v102_v3 }
 0x540   :  { %v1994_v54 = vsel %vm1972_vm5, %v1963_v27, -inf  ;;  %v2042_v26 = vsel %vm1972_vm5, %v1963_v27, 0.0 }
 0x541   :  { %v3513_v56 = vsel %vm1972_vm5, %v1971_v25, 0.0  ;;  %v1969_v40 = vmax.f32 %v1953_v16, 0.0  ;;  %v2018_v33 = vsel %vm1972_vm5, %v1971_v25, -inf  ;;  %v3575_v35 = vsub.s32 %v2103_v13, %v2822_v10 }
 0x543   :  { %2001 = vmax.xlane.f32.xlu0 %v2000_v23  ;;  %1977 = vmax.xlane.f32.xlu1 %v1976_v62  ;;  %v2012_v43 = vsel %vm1972_vm5, %v1969_v40, -inf  ;;  %v2060_v59 = vsel %vm1972_vm5, %v1969_v40, 0.0 }
 0x547   :  { %2007 = vmax.xlane.f32.xlu0 %v2006_v9  ;;  %1983 = vmax.xlane.f32.xlu1 %v1982_v15 }
 0x54b   :  { %2049 = vadd.xlane.f32.xlu0 %v2048_v53  ;;  %1986 = vmax.xlane.f32.xlu1 %v1985_v14 }
 0x54f   :  { %2010 = vmax.xlane.f32.xlu0 %v2009_v24  ;;  %2031 = vadd.xlane.f32.xlu1 %v2030_v41 }
 0x553   :  { %2055 = vadd.xlane.f32.xlu0 %v2054_v21  ;;  %1992 = vmax.xlane.f32.xlu1 %v1991_v48 }
 0x557   :  { %2016 = vmax.xlane.f32.xlu0 %v2015_v17  ;;  %2034 = vadd.xlane.f32.xlu1 %v2033_v38 }
 0x55b   :  { %2058 = vadd.xlane.f32.xlu0 %v2057_v45  ;;  %2040 = vadd.xlane.f32.xlu1 %v2039_v1 }
 0x55f   :  { %2064 = vadd.xlane.f32.xlu0 %v2063_v36  ;;  %1989 = vmax.xlane.f32.xlu1 %v1988_v51 }
 0x563   :  { %2025 = vadd.xlane.f32.xlu0 %v2024_v19  ;;  %1995 = vmax.xlane.f32.xlu1 %v1994_v54 }
 0x567   :  { %2013 = vmax.xlane.f32.xlu0 %v2012_v43  ;;  %2037 = vadd.xlane.f32.xlu1 %v2036_v34 }
 0x56b   :  { %2019 = vmax.xlane.f32.xlu0 %v2018_v33  ;;  %2043 = vadd.xlane.f32.xlu1 %v2042_v26 }
 0x56f   :  { %2061 = vadd.xlane.f32.xlu0 %v2060_v59 }
 0x573   :  { %2067 = vadd.xlane.f32.xlu0 %v3513_v56 }
 0x57c   :  { %2297 = vperm.xlu1 %2677, %v2291_v5  }
 0x580   :  { %2307 = vperm.xlu1 %2677, %v2293_v7  }
 0x584   :  { %2312 = vperm.xlu1 %2677, %v2294_v12  }
 0x589   :  { %2302 = vperm.xlu0 %2676, %v2292_v0  }
 0x58d   :  { %2496 = vperm.xlu0 %2676, %v2493_v22  }
 0x5c0   :  { %v2047_v44 = vpop.xlane.xlu1 %2046  ;;  %v1999_v50 = vpop.xlane.xlu0 %1998 }
 0x5c1   :  { %v2078_v2 = vmul.f32 0.041666668, %v2047_v44  ;;  %v2139_v61 = vrot.slane %v1999_v50, %v3575_v35 }
 0x5c3   :  { %v2242_v10 = vrot.slane %v2078_v2, %v3575_v35 }
 0x5c4   :  { %v2005_v29 = vpop.xlane.xlu0 %2004  ;;  %v1981_v32 = vpop.xlane.xlu1 %1980 }
 0x5c5   :  { %v2147_v63 = vrot.slane %v2005_v29, %v3575_v35  ;;  %v2115_v31 = vrot.slane %v1981_v32, %v3575_v35 }
 0x5c8   :  { %v2053_v28 = vpop.xlane.xlu0 %2052  ;;  %v2023_v37 = vpop.xlane.xlu1 %2022 }
 0x5c9   :  { %v2070_v3 = vmul.f32 0.041666668, %v2023_v37  ;;  %v2080_v40 = vmul.f32 0.041666668, %v2053_v28 }
 0x5cb   :  { %v2210_v27 = vrot.slane %v2070_v3, %v3575_v35  ;;  %v2250_v2 = vrot.slane %v2080_v40, %v3575_v35 }
 0x5cc   :  { %v2029_v57 = vpop.xlane.xlu1 %2028  ;;  %v1975_v25 = vpop.xlane.xlu0 %1974 }
 0x5cd   :  { %v2107_v21 = vrot.slane %v1975_v25, %v3575_v35  ;;  %v2072_v48 = vmul.f32 0.041666668, %v2029_v57 }
 0x5cf   :  { %v2218_v43 = vrot.slane %v2072_v48, %v3575_v35 }
 0x5d0   :  { %v2002_v58 = vpop.xlane.xlu0 %2001  ;;  %v1978_v47 = vpop.xlane.xlu1 %1977 }
 0x5d1   :  { %v2143_v39 = vrot.slane %v2002_v58, %v3575_v35  ;;  %v2111_v20 = vrot.slane %v1978_v47, %v3575_v35 }
 0x5d3   :  { %v2182_v49 = vsel %vm2168_vm7, %v2143_v39, %v2139_v61  ;;  %v2169_v45 = vsel %vm2168_vm7, %v2111_v20, %v2107_v21 }
 0x5d4   :  { %v2008_v55 = vpop.xlane.xlu0 %2007  ;;  %v1984_v56 = vpop.xlane.xlu1 %1983  ;;  %v2183_v16 = vsel %vm2170_vm8, %v2147_v63, %v2182_v49  ;;  %v2171_v33 = vsel %vm2170_vm8, %v2115_v31, %v2169_v45 }
 0x5d5   :  { %v2151_v17 = vrot.slane %v2008_v55, %v3575_v35  ;;  %v2119_v1 = vrot.slane %v1984_v56, %v3575_v35 }
 0x5d7   :  { %v2184_v34 = vsel %vm2172_vm9, %v2151_v17, %v2183_v16  ;;  %v2173_v5 = vsel %vm2172_vm9, %v2119_v1, %v2171_v33  ;;  %v2746_v33 = vmov 0.0|0.0  }
 0x5d8   :  { %v2050_v23 = vpop.xlane.xlu0 %2049  ;;  %v1987_v62 = vpop.xlane.xlu1 %1986 }
 0x5d9   :  { %v2079_v46 = vmul.f32 0.041666668, %v2050_v23  ;;  %v2123_v36 = vrot.slane %v1987_v62, %v3575_v35 }
 0x5db   :  { %v2246_v6 = vrot.slane %v2079_v46, %v3575_v35  ;;  %v2175_v22 = vsel %vm2174_vm10, %v2123_v36, %v2173_v5 }
 0x5dc   :  { %v2011_v52 = vpop.xlane.xlu0 %2010  ;;  %v2032_v42 = vpop.xlane.xlu1 %2031 }
 0x5dd   :  { %v2155_v51 = vrot.slane %v2011_v52, %v3575_v35  ;;  %v2073_v7 = vmul.f32 0.041666668, %v2032_v42  ;;  %v2278_v52 = vsel %vm2168_vm7, %v2246_v6, %v2242_v10 }
 0x5de   :  { %v2279_v48 = vsel %vm2170_vm8, %v2250_v2, %v2278_v52 }
 0x5df   :  { %v2185_v44 = vsel %vm2174_vm10, %v2155_v51, %v2184_v34  ;;  %v2222_v56 = vrot.slane %v2073_v7, %v3575_v35  ;;  %v2289_v34 = vld [vmem:[%s3681_s5 + $0x10] sm:$0xff] }
 0x5e0   :  { %v2056_v8 = vpop.xlane.xlu0 %2055  ;;  %v3567_v9 = vpop.xlane.xlu1 %1992 }
 0x5e1   :  { %v2081_v50 = vmul.f32 0.041666668, %v2056_v8  ;;  %v2131_v29 = vrot.slane %v3567_v9, %v3575_v35 }
 0x5e3   :  { %v2254_v13 = vrot.slane %v2081_v50, %v3575_v35 }
 0x5e4   :  { %v3569_v15 = vpop.xlane.xlu0 %2016  ;;  %v2035_v30 = vpop.xlane.xlu1 %2034 }
 0x5e5   :  { %v2163_v57 = vrot.slane %v3569_v15, %v3575_v35  ;;  %v2074_v25 = vmul.f32 0.041666668, %v2035_v30 }
 0x5e7   :  { %v2226_v39 = vrot.slane %v2074_v25, %v3575_v35 }
 0x5e8   :  { %v2059_v53 = vpop.xlane.xlu0 %2058  ;;  %v3572_v14 = vpop.xlane.xlu1 %2040 }
 0x5e9   :  { %v2082_v58 = vmul.f32 0.041666668, %v2059_v53  ;;  %v2076_v49 = vmul.f32 0.041666668, %v3572_v14 }
 0x5ec   :  { %v3578_v24 = vpop.xlane.xlu0 %2064  ;;  %v1990_v41 = vpop.xlane.xlu1 %1989 }
 0x5ed   :  { %v2127_v19 = vrot.slane %v1990_v41, %v3575_v35  ;;  %v2258_v41 = vrot.slane %v2082_v58, %v3575_v35  ;;  %v2084_v17 = vmul.f32 0.041666668, %v3578_v24  ;;  %v2234_v24 = vrot.slane %v2076_v49, %v3575_v35 }
 0x5ef   :  { %v2177_v32 = vsel %vm2176_vm11, %v2127_v19, %v2175_v22  ;;  %v2266_v36 = vrot.slane %v2084_v17, %v3575_v35 }
 0x5f0   :  { %v2026_v38 = vpop.xlane.xlu0 %2025  ;;  %v1996_v60 = vpop.xlane.xlu1 %1995  ;;  %v2179_v8 = vsel %vm2178_vm12, %v2131_v29, %v2177_v32 }
 0x5f1   :  { %v2071_v4 = vmul.f32 0.041666668, %v2026_v38  ;;  %v2135_v28 = vrot.slane %v1996_v60, %v3575_v35  ;;  %v2280_v60 = vsel %vm2172_vm9, %v2254_v13, %v2279_v48 }
 0x5f2   :  { %v2281_v45 = vsel %vm2174_vm10, %v2258_v41, %v2280_v60 }
 0x5f3   :  { %v2214_v54 = vrot.slane %v2071_v4, %v3575_v35  ;;  %v2181_v30 = vsel %vm2180_vm13, %v2135_v28, %v2179_v8 }
 0x5f4   :  { %v2014_v26 = vpop.xlane.xlu0 %2013  ;;  %v2038_v59 = vpop.xlane.xlu1 %2037 }
 0x5f5   :  { %v2271_v12 = vsel %vm2168_vm7, %v2214_v54, %v2210_v27  ;;  %v2159_v0 = vrot.slane %v2014_v26, %v3575_v35  ;;  %v2075_v23 = vmul.f32 0.041666668, %v2038_v59 }
 0x5f6   :  { %v2272_v47 = vsel %vm2170_vm8, %v2218_v43, %v2271_v12  ;;  %v2288_v43 = vld [vmem:[%s3681_s5 + $0x8] sm:$0xff] }
 0x5f7   :  { %v2186_v37 = vsel %vm2176_vm11, %v2159_v0, %v2185_v44  ;;  %v2273_v15 = vsel %vm2172_vm9, %v2222_v56, %v2272_v47  ;;  %v2230_v3 = vrot.slane %v2075_v23, %v3575_v35  ;;  %v2417_v47 = vld [vmem:[%s3683_s7] sm:$0x1]  ;;  %v2491_v56 = vstv %s3685_s9  ;;  %s2713_s7 = scalar_lea.vmem %s2513_s16, 32 }
 0x5f8   :  { %v2020_v55 = vpop.xlane.xlu0 %2019  ;;  %v2044_v42 = vpop.xlane.xlu1 %2043  ;;  %v2187_v9 = vsel %vm2178_vm12, %v2163_v57, %v2186_v37  ;;  %v2274_v38 = vsel %vm2174_vm10, %v2226_v39, %v2273_v15  ;;  %p2715_p2 = scmp.lt.s32.totalorder %s2713_s7, %s2709_s17 }
 0x5f9   :  { %v2167_v62 = vrot.slane %v2020_v55, %v3575_v35  ;;  %v2077_v21 = vmul.f32 0.041666668, %v2044_v42  ;;  %v2275_v4 = vsel %vm2176_vm11, %v2230_v3, %v2274_v38 }
 0x5fa   :  { %v2276_v27 = vsel %vm2178_vm12, %v2234_v24, %v2275_v4  ;;  %p2716_p3 = por %p2715_p2, %p2714_p1 }
 0x5fb   :  { %v2188_v53 = vsel %vm2180_vm13, %v2167_v62, %v2187_v9  ;;  %v2238_v31 = vrot.slane %v2077_v21, %v3575_v35 }
 0x5fc   :  { %v2062_v20 = vpop.xlane.xlu0 %2061  ;;  %v2641_v61 = vpack.c.bf16 %v2188_v53, %v2181_v30  ;;  %v2298_v26 = vpop.permute.xlu1 %2297  ;;  %p2717_p4 = pnand %p2716_p3, %p2710_p0 }
 0x5fd   :  { %v2083_v10 = vmul.f32 0.041666668, %v2062_v20  ;;  %v2277_v19 = vsel %vm2180_vm13, %v2238_v31, %v2276_v27 }
 0x5fe   :  { %2642 = vmatprep.subr.bf16.mxu0 %v2641_v61 }
 0x5ff   :  { %v2262_v63 = vrot.slane %v2083_v10, %v3575_v35  ;;  %2644 = vmatpush3.bf16.msra.mxu0 %v2641_v61 }
 0x600   :  { %v2068_v1 = vpop.xlane.xlu0 %2067  ;;  %v2308_v59 = vpop.permute.xlu1 %2307 }
 0x601   :  { %v2282_v46 = vsel %vm2176_vm11, %v2262_v63, %v2281_v45  ;;  %v2085_v14 = vmul.f32 0.041666668, %v2068_v1 }
 0x602   :  { %v2283_v16 = vsel %vm2178_vm12, %v2266_v36, %v2282_v46 }
 0x603   :  { %v2270_v51 = vrot.slane %v2085_v14, %v3575_v35  ;;  %v2290_v35 = vld [vmem:[%s3681_s5 + $0x18] sm:$0xff] }
 0x604   :  { %v2313_v44 = vpop.permute.xlu1 %2312 }
 0x605   :  { %v2284_v54 = vsel %vm2180_vm13, %v2270_v51, %v2283_v16 }
 0x606   :  { %v2645_v40 = vpack.c.bf16 %v2284_v54, %v2277_v19 }
 0x608   :  { %2646 = vmatprep.subr.bf16.mxu0 %v2645_v40  ;;  %v2303_v5 = vpop.permute.xlu0 %2302 }
 0x609   :  { %2648 = vmatpush3.bf16.msra.mxu0 %v2645_v40 }
 0x60a   :  { %2649 = vmatprep.subr.bf16.mxu0 %v2746_v33 }
 0x60c   :  { %2601 = vmatmul.mubr.msk.f32.vlgmr.msra.gmra.mrb[2].mxu0 %vm2315_vm6, %v2288_v43  ;;  %v2497_v55 = vpop.permute.xlu0 %2496 }
 0x60d   :  { %2603 = vmatprep.mubr.msk.f32.mxu0 %vm2315_vm6, %v2289_v34  ;;  %v2502_v62 = vrot.slane %v2497_v55, %v2892_v18 }
 0x610   :  { %2604 = vmatmul.mubr.msk.f32.gmra.mrb[4].mxu0 %vm2315_vm6, %v2290_v35 }
 0x611   :  { %2614 = vmatprep.mubr.msk.f32.mxu0 %vm2747_vm14, %v2742_v11 }
 0x6df   :  { %v2602_v7 = vpop.f32.mrb[2].mxu0 }
 0x6e0   :  { %v2400_v12 = vadd.f32 %v2602_v7, %v2303_v5  ;;  %v2394_v0 = vpop.f32.mrb[3].mxu0 }
 0x6e1   :  { %v2395_v6 = vadd.f32 %v2394_v0, %v2298_v26 }
 0x6e2   :  { %v2414_v22 = vmax.f32 %v2400_v12, 0.0 }
 0x6e3   :  { %v2413_v50 = vmax.f32 %v2395_v6, 0.0  ;;  %v2605_v29 = vpop.f32.mrb[4].mxu0 }
 0x6e4   :  { %v2410_v32 = vadd.f32 %v2605_v29, %v2313_v44  ;;  %v2404_v28 = vpop.f32.mrb[5].mxu0 }
 0x6e5   :  { %v2650_v37 = vpack.c.bf16 %v2414_v22, %v2413_v50  ;;  %v2405_v57 = vadd.f32 %v2404_v28, %v2308_v59 }
 0x6e6   :  { %v2416_v25 = vmax.f32 %v2410_v32, 0.0 }
 0x6e7   :  { %v2415_v58 = vmax.f32 %v2405_v57, 0.0  ;;  %2651 = vmatpush3.bf16.msra.mxu0 %v2650_v37 }
 0x6e8   :  { %2652 = vmatprep.subr.bf16.mxu0 %v2746_v33 }
 0x6e9   :  { %v2653_v11 = vpack.c.bf16 %v2416_v25, %v2415_v58 }
 0x6eb   :  { %2654 = vmatpush3.bf16.msra.mxu0 %v2653_v11 }
 0x6ee   :  { %2615 = vmatmul.mubr.msk.f32.vlgmr.msra.gmra.mrb[6].mxu0 %vm2315_vm6, %v2417_v47 }
 0x7c1   :  { %v2487_v23 = vpop.f32.mrb[6].mxu0 }
 0x7c2   :  { %v2492_v52 = vmul.f32 %v2491_v56, %v2487_v23  ;;  %v2616_v42 = vpop.f32.mrb[7].mxu0 }
 0x7c4   :  { %v2503_v8 = vadd.f32 %v2502_v62, %v2492_v52 }
 0x7c6   :  { %2505 = vst.msk [vmem:[#allocation4] sm:$0x1] %vm2504_vm15, %v2503_v8 }
 0x7c7   :  { %2720 = shalt.err (!%p2717_p4)
}
 0x7c8   :  { %s2721_s18 = scalar_lea.hbm %s3686_s10, 16 }
 0x7c9   :  { %p2722_p5 = scmp.ne.s32.totalorder %s3686_s10, %s2721_s18  ;;  %p2725_p6 = scmp.lt.u32.totalorder %s2721_s18, %s3686_s10 }
 0x7cb   :  { %p2727_p7 = pnand %p2725_p6, %p2722_p5 }
 0x7cd   :  { %2730 = shalt.err (!%p2727_p7)
}
 0x7ce   :  { %2515 = dma.vmem_to_hbm [thread:$0]  %s2513_s16, 16, %s3686_s10, [#allocation5]  }
 0x7cf   :  { %2731 = dma.done.wait [#allocation5], 16  }
 0x7d0   :  { %2732 = vsyncadd [#allocation5], 4294967280 }
 0x7d1   :  { %2519 = vsyncpa [#allocation5], 1 }

</bundles_post_ra>
